<compile_context>
chip_gen: v7x
topology: tpu7x:2x2x1
jax: 0.10.0
libtpu: 0.0.40
codegen_flags: <defaults>
</compile_context>

<pallas_src>
import jax
import jax.numpy as jnp
from jax.experimental import pallas as pl
from jax.experimental.pallas import tpu as pltpu

HIDDEN = 32        # config.hidden_size
VOCAB = 256        # config.vocab_size
NUM_CLS = 3        # classifier output classes
CLS_PAD = 128      # lane-dense padding of the classifier output
HPAD = 128         # lane-dense padded width of the dense()/lm_head inner dim
PAD_ID = 0         # tokenizer.pad_token_id
MASK_ID = 5        # tokenizer.mask_token_id
TM = 1024          # token tile (multiple of 64; big tile amortizes grid-step overhead)
TV_MAX = 2048      # vocab tile for the cg online-logsumexp loop
VMEM_LIMIT = 64 * 1024 * 1024
NEG_INF = -1e30


def _round_up(x, m):
    return ((x + m - 1) // m) * m


def _num_tensorcores():
    """Use a 2-way 'parallel' core grid axis only on chips that expose two
    TensorCores per device (v4 / v5p megacore, v7x); v5e / v6e have one."""
    try:
        kind = jax.devices()[0].device_kind.lower()
    except Exception:
        return 1
    return 2 if any(tag in kind for tag in ("v7", "v4", "v5p")) else 1


def _pick_tm(n):
    # Keep tm a multiple of 64 (bf16 sublane-packing safe) and never pad the
    # token axis by more than ~one tile for small inputs.
    return min(TM, max(64, _round_up(n, 64)))


def _grid_dims(n, tm, ncores):
    tiles = pl.cdiv(n, tm)
    if tiles < ncores:
        ncores = 1
    tpc = pl.cdiv(tiles, ncores)
    n_pad = ncores * tpc * tm
    return ncores, tpc, n_pad


def _pad_tokens(h_flat, labels_flat, n_pad):
    n = h_flat.shape[0]
    h_bf = h_flat.astype(jnp.bfloat16)            # no-op if producer emits bf16
    if n_pad != n:
        h_bf = jnp.pad(h_bf, ((0, n_pad - n), (0, 0)))
        labels_flat = jnp.pad(labels_flat, ((0, n_pad - n),), constant_values=-1)
    return h_bf, labels_flat.reshape(n_pad, 1).astype(jnp.int32)


# ----------------------------- in-kernel helpers ---------------------------

def _acc_finalize(acc_ref, s, cnt):
    """Add (sum, count) scalars into lanes [0,0]/[0,1] of the resident (8,128)
    accumulator block.  This runs once per TOKEN TILE (not per vocab step), so
    the iota/select cost is negligible at TM >= 1024."""
    row = jax.lax.broadcasted_iota(jnp.int32, (8, 128), 0)
    lane = jax.lax.broadcasted_iota(jnp.int32, (8, 128), 1)
    acc_ref[...] += (jnp.where((row == 0) & (lane == 0), s, 0.0)
                     + jnp.where((row == 0) & (lane == 1), cnt, 0.0))


def _make_cg_kernel(tile_axis, vocab_axis, tv, v_valid, v_pad):
    mask_tail = v_pad > v_valid   # only emit the pad-column mask when needed

    def kernel(h_ref, wd_ref, bd_ref, wlm_ref, lbl_ref, acc_ref,
               x_sc, m_sc, l_sc, p_sc):
        ti = pl.program_id(tile_axis)
        vi = pl.program_id(vocab_axis)
        nv = pl.num_programs(vocab_axis)

        @pl.when(jnp.logical_and(ti == 0, vi == 0))
        def _():
            acc_ref[...] = jnp.zeros_like(acc_ref)

        # First vocab step of each token tile: x = tanh(h @ Wd + bd), cached
        # lane-dense (tm, 128) bf16 so the vocab loop only streams W_lm blocks.
        @pl.when(vi == 0)
        def _():
            x = jnp.dot(h_ref[...], wd_ref[...],
                        preferred_element_type=jnp.float32)
            x_sc[...] = jnp.tanh(x + bd_ref[...]).astype(jnp.bfloat16)
            m_sc[...] = jnp.full_like(m_sc, -jnp.inf)
            l_sc[...] = jnp.zeros_like(l_sc)
            p_sc[...] = jnp.zeros_like(p_sc)

        logits = jnp.dot(x_sc[...], wlm_ref[...],
                         preferred_element_type=jnp.float32)       # (tm, tv) f32
        tm = logits.shape[0]
        col = jax.lax.broadcasted_iota(jnp.int32, (tm, tv), 1) + vi * tv
        if mask_tail:
            logits = jnp.where(col < v_valid, logits, NEG_INF)

        labels = lbl_ref[...]                                      # (tm, 1) i32
        # online logsumexp across vocab tiles
        m_prev = m_sc[...]
        m_new = jnp.maximum(m_prev, jnp.max(logits, axis=-1, keepdims=True))
        l_sc[...] = (l_sc[...] * jnp.exp(m_prev - m_new)
                     + jnp.sum(jnp.exp(logits - m_new), axis=-1, keepdims=True))
        m_sc[...] = m_new
        # the label column lands in exactly one vocab tile; -1 labels pick nothing
        p_sc[...] += jnp.sum(jnp.where(col == labels, logits, 0.0),
                             axis=-1, keepdims=True)

        @pl.when(vi == nv - 1)
        def _():
            nll = m_sc[...] + jnp.log(l_sc[...]) - p_sc[...]       # (tm, 1)
            valid = (labels >= 0).astype(jnp.float32)
            s = jnp.sum(jnp.where(valid > 0.0, nll, 0.0))          # NaN-safe mask
            cnt = jnp.sum(valid)
            _acc_finalize(acc_ref, s, cnt)

    return kernel


def _make_dp_kernel(tile_axis):
    def kernel(h_ref, wc_ref, bc_ref, lbl_ref, logits_ref, acc_ref):
        @pl.when(pl.program_id(tile_axis) == 0)
        def _():
            acc_ref[...] = jnp.zeros_like(acc_ref)

        logits = jnp.dot(h_ref[...], wc_ref[...],
                         preferred_element_type=jnp.float32) + bc_ref[...]
        # padded class columns carry -1e30 from the bias -> zero softmax mass,
        # no per-step class mask needed.  Store lane-dense bf16 (half traffic).
        logits_ref[...] = logits.astype(jnp.bfloat16)

        labels = lbl_ref[...]                                      # (tm, 1) i32
        tm, c = logits.shape
        col = jax.lax.broadcasted_iota(jnp.int32, (tm, c), 1)
        m = jnp.max(logits, axis=-1, keepdims=True)
        lse = m + jnp.log(jnp.sum(jnp.exp(logits - m), axis=-1, keepdims=True))
        picked = jnp.sum(jnp.where(col == labels, logits, 0.0),
                         axis=-1, keepdims=True)
        nll = lse - picked
        valid = (labels >= 0).astype(jnp.float32)
        s = jnp.sum(jnp.where(valid > 0.0, nll, 0.0))
        cnt = jnp.sum(valid)
        _acc_finalize(acc_ref, s, cnt)

    return kernel


# ----------------------------- wrappers -------------------------------------

def cg_loss_and_count(h_flat, labels_flat, w_dense_pad, b_dense_pad, w_lm_pad,
                      vocab_size):
    """Fused cg head: returns (mean masked CE loss, valid-token count)."""
    n, hdim = h_flat.shape
    hpad, v_pad = w_lm_pad.shape
    tv = min(TV_MAX, v_pad)
    assert v_pad % tv == 0
    nv = v_pad // tv

    ncores = _num_tensorcores()
    tm = _pick_tm(n)
    ncores, tpc, n_pad = _grid_dims(n, tm, ncores)
    h_pad, labels2 = _pad_tokens(h_flat, labels_flat, n_pad)

    if ncores == 1:
        grid = (tpc, nv)
        tok = lambda i, v: (i, 0)
        const = lambda i, v: (0, 0)
        wlm_map = lambda i, v: (0, v)
        acc_map = lambda i, v: (0, 0)
        tile_axis, vocab_axis = 0, 1
        sem = ("arbitrary", "arbitrary")
    else:
        grid = (ncores, tpc, nv)
        tok = lambda c, i, v: (c * tpc + i, 0)
        const = lambda c, i, v: (0, 0)
        wlm_map = lambda c, i, v: (0, v)
        acc_map = lambda c, i, v: (c, 0)
        tile_axis, vocab_axis = 1, 2
        sem = ("parallel", "arbitrary", "arbitrary")

    kernel = _make_cg_kernel(tile_axis, vocab_axis, tv, vocab_size, v_pad)

    acc = pl.pallas_call(
        kernel,
        out_shape=jax.ShapeDtypeStruct((ncores * 8, 128), jnp.float32),
        grid_spec=pltpu.PrefetchScalarGridSpec(
            num_scalar_prefetch=0,
            grid=grid,
            in_specs=[
                pl.BlockSpec((tm, hdim), tok),
                pl.BlockSpec((hdim, HPAD), const),
                pl.BlockSpec((1, HPAD), const),
                pl.BlockSpec((HPAD, tv), wlm_map),
                pl.BlockSpec((tm, 1), tok),
            ],
            out_specs=pl.BlockSpec((8, 128), acc_map),
            scratch_shapes=[
                pltpu.VMEM((tm, HPAD), jnp.bfloat16),   # cached tanh(dense(h))
                pltpu.VMEM((tm, 1), jnp.float32),       # running max
                pltpu.VMEM((tm, 1), jnp.float32),       # running sum-exp
                pltpu.VMEM((tm, 1), jnp.float32),       # picked logit
            ],
        ),
        compiler_params=pltpu.CompilerParams(
            dimension_semantics=sem, vmem_limit_bytes=VMEM_LIMIT),
    )(h_pad, w_dense_pad, b_dense_pad, w_lm_pad, labels2)

    acc = acc.reshape(ncores, 8, 128)
    total = jnp.sum(acc[:, 0, 0])
    count = jnp.sum(acc[:, 0, 1])
    loss = total / jnp.maximum(count, 1.0)
    return loss, count


def dp_logits_and_loss(h_flat, labels_flat, w_cls_pad, b_cls_pad):
    """Fused dp head: returns (mean masked CE loss, lane-dense bf16 logits, count)."""
    n, hdim = h_flat.shape
    cpad = w_cls_pad.shape[1]

    ncores = _num_tensorcores()
    tm = _pick_tm(n)
    ncores, tpc, n_pad = _grid_dims(n, tm, ncores)
    h_pad, labels2 = _pad_tokens(h_flat, labels_flat, n_pad)

    if ncores == 1:
        grid = (tpc,)
        tok = lambda i: (i, 0)
        const = lambda i: (0, 0)
        acc_map = lambda i: (0, 0)
        tile_axis = 0
        sem = ("arbitrary",)
    else:
        grid = (ncores, tpc)
        tok = lambda c, i: (c * tpc + i, 0)
        const = lambda c, i: (0, 0)
        acc_map = lambda c, i: (c, 0)
        tile_axis = 1
        sem = ("parallel", "arbitrary")

    kernel = _make_dp_kernel(tile_axis)

    logits_pad, acc = pl.pallas_call(
        kernel,
        out_shape=(
            jax.ShapeDtypeStruct((n_pad, cpad), jnp.bfloat16),
            jax.ShapeDtypeStruct((ncores * 8, 128), jnp.float32),
        ),
        grid_spec=pltpu.PrefetchScalarGridSpec(
            num_scalar_prefetch=0,
            grid=grid,
            in_specs=[
                pl.BlockSpec((tm, hdim), tok),
                pl.BlockSpec((hdim, cpad), const),
                pl.BlockSpec((1, cpad), const),
                pl.BlockSpec((tm, 1), tok),
            ],
            out_specs=(
                pl.BlockSpec((tm, cpad), tok),
                pl.BlockSpec((8, 128), acc_map),
            ),
        ),
        compiler_params=pltpu.CompilerParams(
            dimension_semantics=sem, vmem_limit_bytes=VMEM_LIMIT),
    )(h_pad, w_cls_pad, b_cls_pad, labels2)

    acc = acc.reshape(ncores, 8, 128)
    total = jnp.sum(acc[:, 0, 0])
    count = jnp.sum(acc[:, 0, 1])
    loss = total / jnp.maximum(count, 1.0)
    return loss, logits_pad[:n], count


# ----------------------------- Seq2Seq module -------------------------------

class Seq2SeqPallas:
    def __init__(self, key, hidden_size=HIDDEN, vocab_size=VOCAB,
                 pad_id=PAD_ID, mask_id=MASK_ID):
        k0, k1, k2 = jax.random.split(key, 3)
        s = 0.02
        self.hidden_size = hidden_size
        self.vocab_size = vocab_size
        self.pad_id = pad_id
        self.mask_id = mask_id

        # nn.Linear weights, stored [in, out]; matmul operands kept in bf16.
        self.w_dense = (jax.random.normal(k0, (hidden_size, hidden_size),
                                          jnp.float32) * s).astype(jnp.bfloat16)
        self.b_dense = jnp.zeros((1, hidden_size), jnp.float32)
        self.w_lm = (jax.random.normal(k2, (hidden_size, vocab_size),
                                       jnp.float32) * s).astype(jnp.bfloat16)
        self.w_cls = (jax.random.normal(k1, (hidden_size, NUM_CLS),
                                        jnp.float32) * s).astype(jnp.bfloat16)

        # --- lane-dense padded copies used by the kernels (built once) -------
        # Pad the dense output / lm_head input to 128 lanes: padded x columns
        # are tanh(0+0)=0 and the matching W_lm rows are 0 -> logits unchanged.
        self.w_dense_pad = jnp.zeros((hidden_size, HPAD), jnp.bfloat16
                                     ).at[:, :hidden_size].set(self.w_dense)
        self.b_dense_pad = jnp.zeros((1, HPAD), jnp.float32
                                     ).at[:, :hidden_size].set(self.b_dense)
        tv = min(TV_MAX, _round_up(vocab_size, 128))
        self.v_pad = _round_up(vocab_size, tv)
        self.w_lm_pad = jnp.zeros((HPAD, self.v_pad), jnp.bfloat16
                                  ).at[:hidden_size, :vocab_size].set(self.w_lm)
        # classifier: lane-dense 128-wide output slab; -1e30 baked into padded
        # bias columns (zero softmax mass; downstream reads only NUM_CLS cols).
        self.w_cls_pad = jnp.zeros((hidden_size, CLS_PAD), jnp.bfloat16
                                   ).at[:, :NUM_CLS].set(self.w_cls)
        self.b_cls_pad = jnp.full((1, CLS_PAD), NEG_INF, jnp.float32
                                  ).at[:, :NUM_CLS].set(0.0)

    def get_t5_vec(self, key, batch, target_len):
        # TODO(synk): external T5 backbone (self.model) / tokenizer are not
        # translatable; emit deterministic stand-in decoder hidden states,
        # already in bf16 so the kernels' dominant input DMA is half-width.
        return jax.random.normal(key, (batch, target_len, self.hidden_size),
                                 jnp.float32).astype(jnp.bfloat16)

    # --- label construction: fold shift + active mask into labels (-1 = ignore)
    def _cg_labels(self, target_ids):
        b, t = target_ids.shape
        shifted = target_ids[:, 1:]
        lbl = jnp.where(shifted != self.pad_id, shifted, -1)
        lbl = jnp.concatenate(
            [lbl, jnp.full((b, 1), -1, dtype=target_ids.dtype)], axis=1)
        return lbl.reshape(-1).astype(jnp.int32)

    def _dp_labels(self, source_ids, target_ids):
        # TODO(synk): original code indexes B*(T-1) shifted rows with a B*T-long
        # mask (shape mismatch); we align by dropping the last source position.
        b, t = target_ids.shape
        active = source_ids[:, :-1] == self.mask_id
        shifted = target_ids[:, 1:]
        lbl = jnp.where(active & (shifted != -1), shifted, -1)
        lbl = jnp.concatenate(
            [lbl, jnp.full((b, 1), -1, dtype=target_ids.dtype)], axis=1)
        return lbl.reshape(-1).astype(jnp.int32)

    def forward_cg(self, hidden_states, target_ids):
        b, t, h = hidden_states.shape
        labels = self._cg_labels(target_ids)
        loss, cnt = cg_loss_and_count(
            hidden_states.reshape(b * t, h), labels,
            self.w_dense_pad, self.b_dense_pad, self.w_lm_pad, self.vocab_size)
        return loss, loss * cnt, cnt

    def forward_dp(self, hidden_states, source_ids, target_ids):
        b, t, h = hidden_states.shape
        labels = self._dp_labels(source_ids, target_ids)
        loss, logits_pad, _ = dp_logits_and_loss(
            hidden_states.reshape(b * t, h), labels,
            self.w_cls_pad, self.b_cls_pad)
        logits = logits_pad[:, :NUM_CLS].astype(jnp.float32).reshape(b, t, NUM_CLS)
        return loss, logits

    def forward(self, task, hidden_states, source_ids=None, target_ids=None):
        if task == 'cg':
            return self.forward_cg(hidden_states, target_ids)
        elif task == 'dp':
            return self.forward_dp(hidden_states, source_ids, target_ids)
        raise ValueError(task)


# ----------------------------- reference (pure JAX) -------------------------

def _bf16(x):
    return x.astype(jnp.bfloat16).astype(jnp.float32)


def _ref_masked_ce(logits2d, labels1d, active1d):
    valid = jnp.logical_and(active1d, labels1d != -1)
    lse = jax.scipy.special.logsumexp(logits2d, axis=-1)
    picked = jnp.take_along_axis(
        logits2d, jnp.maximum(labels1d, 0)[:, None], axis=-1)[:, 0]
    nll = lse - picked
    cnt = jnp.sum(valid.astype(jnp.float32))
    return jnp.sum(jnp.where(valid, nll, 0.0)) / jnp.maximum(cnt, 1.0), cnt


def ref_cg(m, hidden, target_ids):
    x = jnp.tanh(_bf16(hidden) @ m.w_dense.astype(jnp.float32) + m.b_dense)
    logits = _bf16(x) @ m.w_lm.astype(jnp.float32)
    active = (target_ids[:, 1:] != m.pad_id).reshape(-1)
    sl = logits[:, :-1, :].reshape(-1, m.vocab_size)
    lbl = target_ids[:, 1:].reshape(-1)
    return _ref_masked_ce(sl, lbl, active)


def ref_dp(m, hidden, source_ids, target_ids):
    logits = _bf16(hidden) @ m.w_cls.astype(jnp.float32)
    active = (source_ids[:, :-1] == m.mask_id).reshape(-1)
    sl = logits[:, :-1, :].reshape(-1, NUM_CLS)
    lbl = target_ids[:, 1:].reshape(-1)
    loss, _ = _ref_masked_ce(sl, lbl, active)
    return loss, logits


# ----------------------------- demo -----------------------------------------

if __name__ == "__main__":
    key = jax.random.PRNGKey(0)
    k_model, k_hid, k_src, k_tgt, k_dptgt = jax.random.split(key, 5)

    B, T = 2, 8
    model = Seq2SeqPallas(k_model)

    # synthetic token ids (some pads, some mask tokens)
    source_ids = jax.random.randint(k_src, (B, T), 0, VOCAB, dtype=jnp.int32)
    source_ids = source_ids.at[:, 2].set(MASK_ID).at[:, 5].set(MASK_ID)
    target_ids = jax.random.randint(k_tgt, (B, T), 1, VOCAB, dtype=jnp.int32)
    target_ids = target_ids.at[:, -1].set(PAD_ID)          # trailing pad
    dp_target_ids = jax.random.randint(k_dptgt, (B, T), 0, NUM_CLS, dtype=jnp.int32)

    # stand-in for T5 decoder hidden states (bf16)
    hidden_states = model.get_t5_vec(k_hid, B, T)

    # ---- 'cg' task: tanh(dense) -> lm_head -> masked CE (single fused kernel)
    cg_loss, cg_loss_sum, cg_cnt = model.forward('cg', hidden_states,
                                                 target_ids=target_ids)
    jax.block_until_ready((cg_loss, cg_loss_sum, cg_cnt))

    # ---- 'dp' task: classifier -> masked CE (single fused kernel)
    dp_loss, dp_logits = model.forward('dp', hidden_states,
                                       source_ids=source_ids,
                                       target_ids=dp_target_ids)
    jax.block_until_ready((dp_loss, dp_logits))

    # correctness check against pure-JAX reference (mirrors the bf16 MXU path)
    ref_cg_loss, ref_cg_cnt = ref_cg(model, hidden_states, target_ids)
    ref_dp_loss, ref_dp_logits = ref_dp(model, hidden_states, source_ids,
                                        dp_target_ids)
    assert jnp.allclose(cg_loss, ref_cg_loss, rtol=1e-4, atol=5e-4), \
        (cg_loss, ref_cg_loss)
    assert jnp.allclose(cg_cnt, ref_cg_cnt), (cg_cnt, ref_cg_cnt)
    assert jnp.allclose(dp_loss, ref_dp_loss, rtol=1e-4, atol=5e-4), \
        (dp_loss, ref_dp_loss)
    # dp logits are written back in bf16 (halved HBM traffic) -> looser tolerance
    assert jnp.allclose(dp_logits, ref_dp_logits, rtol=2e-2, atol=1e-2), \
        float(jnp.max(jnp.abs(dp_logits - ref_dp_logits)))

    print("KERNEL_OK")
</pallas_src>

<mosaic_0001>
module attributes {stable_mosaic.version = 11 : i64} {
  func.func @kernel(%arg0: i32, %arg1: i32, %arg2: memref<64x32xbf16, #tpu.memory_space<vmem>>, %arg3: memref<32x128xbf16, #tpu.memory_space<vmem>>, %arg4: memref<1x128xf32, #tpu.memory_space<vmem>>, %arg5: memref<128x256xbf16, #tpu.memory_space<vmem>>, %arg6: memref<64x1xi32, #tpu.memory_space<vmem>>, %arg7: memref<8x128xf32, #tpu.memory_space<vmem>>, %arg8: memref<64x128xbf16, #tpu.memory_space<vmem>>, %arg9: memref<64x1xf32, #tpu.memory_space<vmem>>, %arg10: memref<64x1xf32, #tpu.memory_space<vmem>>, %arg11: memref<64x1xf32, #tpu.memory_space<vmem>>) attributes {dimension_semantics = [#tpu.dimension_semantics<arbitrary>, #tpu.dimension_semantics<arbitrary>], iteration_bounds = array<i64: 1, 1>, scalar_prefetch = 0 : i64, scratch_operands = 4 : i64, tpu.core_type = #tpu.core_type<tc>, window_params = [{transform_indices = @transform_0, window_bounds = array<i64: 64, 32>}, {pipeline_mode = #tpu.pipeline_mode<synchronous>, transform_indices = @transform_1, window_bounds = array<i64: 32, 128>}, {pipeline_mode = #tpu.pipeline_mode<synchronous>, transform_indices = @transform_2, window_bounds = array<i64: 1, 128>}, {transform_indices = @transform_3, window_bounds = array<i64: 128, 256>}, {transform_indices = @transform_4, window_bounds = array<i64: 64, 1>}, {pipeline_mode = #tpu.pipeline_mode<synchronous>, transform_indices = @transform_5, window_bounds = array<i64: 8, 128>}]} {
    %c0_i32 = arith.constant 0 : i32
    %0 = arith.cmpi eq, %arg0, %c0_i32 : i32
    %c0_i32_0 = arith.constant 0 : i32
    %1 = arith.cmpi eq, %arg1, %c0_i32_0 : i32
    %2 = arith.andi %0, %1 : i1
    %3 = arith.extui %2 : i1 to i32
    %c0_i32_1 = arith.constant 0 : i32
    %4 = arith.cmpi ne, %3, %c0_i32_1 : i32
    scf.if %4 {
      %cst_27 = arith.constant 0.000000e+00 : f32
      %44 = vector.broadcast %cst_27 : f32 to vector<8x128xf32>
      %c0_28 = arith.constant 0 : index
      %c0_29 = arith.constant 0 : index
      %45 = vector.load %arg7[%c0_28, %c0_29] : memref<8x128xf32, #tpu.memory_space<vmem>>, vector<8x128xf32>
      tpu.vector_store %arg7[%c0_28, %c0_29], %44 {strides = array<i32>} : memref<8x128xf32, #tpu.memory_space<vmem>>, vector<8x128xf32>,
    } else {
    }
    %c0_i32_2 = arith.constant 0 : i32
    %5 = arith.cmpi eq, %arg1, %c0_i32_2 : i32
    %6 = arith.extui %5 : i1 to i32
    %c0_i32_3 = arith.constant 0 : i32
    %7 = arith.cmpi ne, %6, %c0_i32_3 : i32
    scf.if %7 {
      %c0_27 = arith.constant 0 : index
      %c0_28 = arith.constant 0 : index
      %44 = vector.load %arg2[%c0_27, %c0_28] : memref<64x32xbf16, #tpu.memory_space<vmem>>, vector<64x32xbf16>
      %c0_29 = arith.constant 0 : index
      %c0_30 = arith.constant 0 : index
      %45 = vector.load %arg3[%c0_29, %c0_30] : memref<32x128xbf16, #tpu.memory_space<vmem>>, vector<32x128xbf16>
      %cst_31 = arith.constant dense<0.000000e+00> : vector<64x128xf32>
      %46 = tpu.matmul %44, %45, %cst_31 {dimension_numbers = #tpu.dot_dimension_numbers<[1], [0], [0], [1], [0, 0, 1, 1], [], []>} : vector<64x32xbf16>, vector<32x128xbf16>, vector<64x128xf32> -> vector<64x128xf32>
      %c0_32 = arith.constant 0 : index
      %c0_33 = arith.constant 0 : index
      %47 = vector.load %arg4[%c0_32, %c0_33] : memref<1x128xf32, #tpu.memory_space<vmem>>, vector<1x128xf32>
      %48 = vector.broadcast %47 : vector<1x128xf32> to vector<64x128xf32>
      %49 = arith.addf %46, %48 : vector<64x128xf32>
      %50 = math.tanh %49 : vector<64x128xf32>
      %51 = arith.truncf %50 : vector<64x128xf32> to vector<64x128xbf16>
      %c0_34 = arith.constant 0 : index
      %c0_35 = arith.constant 0 : index
      %52 = vector.load %arg8[%c0_34, %c0_35] : memref<64x128xbf16, #tpu.memory_space<vmem>>, vector<64x128xbf16>
      tpu.vector_store %arg8[%c0_34, %c0_35], %51 {strides = array<i32>} : memref<64x128xbf16, #tpu.memory_space<vmem>>, vector<64x128xbf16>,
      %cst_36 = arith.constant 0xFF800000 : f32
      %53 = vector.broadcast %cst_36 : f32 to vector<64x1xf32>
      %c0_37 = arith.constant 0 : index
      %c0_38 = arith.constant 0 : index
      %54 = vector.load %arg9[%c0_37, %c0_38] : memref<64x1xf32, #tpu.memory_space<vmem>>, vector<64x1xf32>
      tpu.vector_store %arg9[%c0_37, %c0_38], %53 {strides = array<i32>} : memref<64x1xf32, #tpu.memory_space<vmem>>, vector<64x1xf32>,
      %cst_39 = arith.constant 0.000000e+00 : f32
      %55 = vector.broadcast %cst_39 : f32 to vector<64x1xf32>
      %c0_40 = arith.constant 0 : index
      %c0_41 = arith.constant 0 : index
      %56 = vector.load %arg10[%c0_40, %c0_41] : memref<64x1xf32, #tpu.memory_space<vmem>>, vector<64x1xf32>
      tpu.vector_store %arg10[%c0_40, %c0_41], %55 {strides = array<i32>} : memref<64x1xf32, #tpu.memory_space<vmem>>, vector<64x1xf32>,
      %cst_42 = arith.constant 0.000000e+00 : f32
      %57 = vector.broadcast %cst_42 : f32 to vector<64x1xf32>
      %c0_43 = arith.constant 0 : index
      %c0_44 = arith.constant 0 : index
      %58 = vector.load %arg11[%c0_43, %c0_44] : memref<64x1xf32, #tpu.memory_space<vmem>>, vector<64x1xf32>
      tpu.vector_store %arg11[%c0_43, %c0_44], %57 {strides = array<i32>} : memref<64x1xf32, #tpu.memory_space<vmem>>, vector<64x1xf32>,
    } else {
    }
    %c0 = arith.constant 0 : index
    %c0_4 = arith.constant 0 : index
    %8 = vector.load %arg8[%c0, %c0_4] : memref<64x128xbf16, #tpu.memory_space<vmem>>, vector<64x128xbf16>
    %c0_5 = arith.constant 0 : index
    %c0_6 = arith.constant 0 : index
    %9 = vector.load %arg5[%c0_5, %c0_6] : memref<128x256xbf16, #tpu.memory_space<vmem>>, vector<128x256xbf16>
    %cst = arith.constant dense<0.000000e+00> : vector<64x256xf32>
    %10 = tpu.matmul %8, %9, %cst {dimension_numbers = #tpu.dot_dimension_numbers<[1], [0], [0], [1], [0, 0, 1, 1], [], []>} : vector<64x128xbf16>, vector<128x256xbf16>, vector<64x256xf32> -> vector<64x256xf32>
    %11 = tpu.iota {dimensions = array<i32: 1>} : vector<64x256xi32>
    %c256_i32 = arith.constant 256 : i32
    %12 = arith.muli %arg1, %c256_i32 : i32
    %13 = vector.broadcast %12 : i32 to vector<64x256xi32>
    %14 = arith.addi %11, %13 : vector<64x256xi32>
    %c0_7 = arith.constant 0 : index
    %c0_8 = arith.constant 0 : index
    %15 = vector.load %arg6[%c0_7, %c0_8] : memref<64x1xi32, #tpu.memory_space<vmem>>, vector<64x1xi32>
    %c0_9 = arith.constant 0 : index
    %c0_10 = arith.constant 0 : index
    %16 = vector.load %arg9[%c0_9, %c0_10] : memref<64x1xf32, #tpu.memory_space<vmem>>, vector<64x1xf32>
    %cst_11 = arith.constant dense<0xFF800000> : vector<64xf32>
    %17 = vector.multi_reduction <maximumf>, %10, %cst_11 [1] : vector<64x256xf32> to vector<64xf32>
    %18 = vector.shape_cast %17 : vector<64xf32> to vector<64x1xf32>
    %19 = arith.maximumf %16, %18 : vector<64x1xf32>
    %c0_12 = arith.constant 0 : index
    %c0_13 = arith.constant 0 : index
    %20 = vector.load %arg10[%c0_12, %c0_13] : memref<64x1xf32, #tpu.memory_space<vmem>>, vector<64x1xf32>
    %21 = arith.subf %16, %19 : vector<64x1xf32>
    %22 = math.exp %21 : vector<64x1xf32>
    %23 = arith.mulf %20, %22 : vector<64x1xf32>
    %24 = vector.broadcast %19 : vector<64x1xf32> to vector<64x256xf32>
    %25 = arith.subf %10, %24 : vector<64x256xf32>
    %26 = math.exp %25 : vector<64x256xf32>
    %cst_14 = arith.constant dense<0.000000e+00> : vector<64xf32>
    %27 = vector.multi_reduction <add>, %26, %cst_14 [1] : vector<64x256xf32> to vector<64xf32>
    %28 = vector.shape_cast %27 : vector<64xf32> to vector<64x1xf32>
    %29 = arith.addf %23, %28 : vector<64x1xf32>
    %c0_15 = arith.constant 0 : index
    %c0_16 = arith.constant 0 : index
    %30 = vector.load %arg10[%c0_15, %c0_16] : memref<64x1xf32, #tpu.memory_space<vmem>>, vector<64x1xf32>
    tpu.vector_store %arg10[%c0_15, %c0_16], %29 {strides = array<i32>} : memref<64x1xf32, #tpu.memory_space<vmem>>, vector<64x1xf32>,
    %c0_17 = arith.constant 0 : index
    %c0_18 = arith.constant 0 : index
    %31 = vector.load %arg9[%c0_17, %c0_18] : memref<64x1xf32, #tpu.memory_space<vmem>>, vector<64x1xf32>
    tpu.vector_store %arg9[%c0_17, %c0_18], %19 {strides = array<i32>} : memref<64x1xf32, #tpu.memory_space<vmem>>, vector<64x1xf32>,
    %c0_19 = arith.constant 0 : index
    %c0_20 = arith.constant 0 : index
    %32 = vector.load %arg11[%c0_19, %c0_20] : memref<64x1xf32, #tpu.memory_space<vmem>>, vector<64x1xf32>
    %33 = vector.broadcast %15 : vector<64x1xi32> to vector<64x256xi32>
    %34 = arith.cmpi eq, %14, %33 : vector<64x256xi32>
    %cst_21 = arith.constant 0.000000e+00 : f32
    %35 = vector.broadcast %cst_21 : f32 to vector<64x256xf32>
    %36 = arith.select %34, %10, %35 : vector<64x256xi1>, vector<64x256xf32>
    %cst_22 = arith.constant dense<0.000000e+00> : vector<64xf32>
    %37 = vector.multi_reduction <add>, %36, %cst_22 [1] : vector<64x256xf32> to vector<64xf32>
    %38 = vector.shape_cast %37 : vector<64xf32> to vector<64x1xf32>
    %39 = arith.addf %32, %38 : vector<64x1xf32>
    %c0_23 = arith.constant 0 : index
    %c0_24 = arith.constant 0 : index
    %40 = vector.load %arg11[%c0_23, %c0_24] : memref<64x1xf32, #tpu.memory_space<vmem>>, vector<64x1xf32>
    tpu.vector_store %arg11[%c0_23, %c0_24], %39 {strides = array<i32>} : memref<64x1xf32, #tpu.memory_space<vmem>>, vector<64x1xf32>,
    %c0_i32_25 = arith.constant 0 : i32
    %41 = arith.cmpi eq, %arg1, %c0_i32_25 : i32
    %42 = arith.extui %41 : i1 to i32
    %c0_i32_26 = arith.constant 0 : i32
    %43 = arith.cmpi ne, %42, %c0_i32_26 : i32
    scf.if %43 {
      %c0_27 = arith.constant 0 : index
      %c0_28 = arith.constant 0 : index
      %44 = vector.load %arg9[%c0_27, %c0_28] : memref<64x1xf32, #tpu.memory_space<vmem>>, vector<64x1xf32>
      %c0_29 = arith.constant 0 : index
      %c0_30 = arith.constant 0 : index
      %45 = vector.load %arg10[%c0_29, %c0_30] : memref<64x1xf32, #tpu.memory_space<vmem>>, vector<64x1xf32>
      %46 = math.log %45 : vector<64x1xf32>
      %47 = arith.addf %44, %46 : vector<64x1xf32>
      %c0_31 = arith.constant 0 : index
      %c0_32 = arith.constant 0 : index
      %48 = vector.load %arg11[%c0_31, %c0_32] : memref<64x1xf32, #tpu.memory_space<vmem>>, vector<64x1xf32>
      %49 = arith.subf %47, %48 : vector<64x1xf32>
      %c0_i32_33 = arith.constant 0 : i32
      %50 = vector.broadcast %c0_i32_33 : i32 to vector<64x1xi32>
      %51 = arith.cmpi sge, %15, %50 : vector<64x1xi32>
      %52 = arith.extui %51 : vector<64x1xi1> to vector<64x1xi32>
      %53 = arith.sitofp %52 : vector<64x1xi32> to vector<64x1xf32>
      %cst_34 = arith.constant 0.000000e+00 : f32
      %54 = vector.broadcast %cst_34 : f32 to vector<64x1xf32>
      %55 = arith.cmpf ogt, %53, %54 : vector<64x1xf32>
      %cst_35 = arith.constant 0.000000e+00 : f32
      %56 = vector.broadcast %cst_35 : f32 to vector<64x1xf32>
      %57 = arith.select %55, %49, %56 : vector<64x1xi1>, vector<64x1xf32>
      %58 = vector.shape_cast %57 : vector<64x1xf32> to vector<1x64x1xf32>
      %cst_36 = arith.constant dense<0.000000e+00> : vector<1xf32>
      %59 = vector.multi_reduction <add>, %58, %cst_36 [1, 2] : vector<1x64x1xf32> to vector<1xf32>
      %60 = vector.shape_cast %59 : vector<1xf32> to vector<1x1x1xf32>
      %61 = vector.extract %60[0, 0, 0] : f32 from vector<1x1x1xf32>
      %62 = vector.shape_cast %53 : vector<64x1xf32> to vector<1x64x1xf32>
      %cst_37 = arith.constant dense<0.000000e+00> : vector<1xf32>
      %63 = vector.multi_reduction <add>, %62, %cst_37 [1, 2] : vector<1x64x1xf32> to vector<1xf32>
      %64 = vector.shape_cast %63 : vector<1xf32> to vector<1x1x1xf32>
      %65 = vector.extract %64[0, 0, 0] : f32 from vector<1x1x1xf32>
      %66 = tpu.iota {dimensions = array<i32: 0>} : vector<8x128xi32>
      %67 = tpu.iota {dimensions = array<i32: 1>} : vector<8x128xi32>
      %c0_38 = arith.constant 0 : index
      %c0_39 = arith.constant 0 : index
      %68 = vector.load %arg7[%c0_38, %c0_39] : memref<8x128xf32, #tpu.memory_space<vmem>>, vector<8x128xf32>
      %c0_i32_40 = arith.constant 0 : i32
      %69 = vector.broadcast %c0_i32_40 : i32 to vector<8x128xi32>
      %70 = arith.cmpi eq, %66, %69 : vector<8x128xi32>
      %c0_i32_41 = arith.constant 0 : i32
      %71 = vector.broadcast %c0_i32_41 : i32 to vector<8x128xi32>
      %72 = arith.cmpi eq, %67, %71 : vector<8x128xi32>
      %73 = arith.andi %70, %72 : vector<8x128xi1>
      %cst_42 = arith.constant 0.000000e+00 : f32
      %74 = vector.broadcast %61 : f32 to vector<8x128xf32>
      %75 = vector.broadcast %cst_42 : f32 to vector<8x128xf32>
      %76 = arith.select %73, %74, %75 : vector<8x128xi1>, vector<8x128xf32>
      %c0_i32_43 = arith.constant 0 : i32
      %77 = vector.broadcast %c0_i32_43 : i32 to vector<8x128xi32>
      %78 = arith.cmpi eq, %66, %77 : vector<8x128xi32>
      %c1_i32 = arith.constant 1 : i32
      %79 = vector.broadcast %c1_i32 : i32 to vector<8x128xi32>
      %80 = arith.cmpi eq, %67, %79 : vector<8x128xi32>
      %81 = arith.andi %78, %80 : vector<8x128xi1>
      %cst_44 = arith.constant 0.000000e+00 : f32
      %82 = vector.broadcast %65 : f32 to vector<8x128xf32>
      %83 = vector.broadcast %cst_44 : f32 to vector<8x128xf32>
      %84 = arith.select %81, %82, %83 : vector<8x128xi1>, vector<8x128xf32>
      %85 = arith.addf %76, %84 : vector<8x128xf32>
      %86 = arith.addf %68, %85 : vector<8x128xf32>
      %c0_45 = arith.constant 0 : index
      %c0_46 = arith.constant 0 : index
      %87 = vector.load %arg7[%c0_45, %c0_46] : memref<8x128xf32, #tpu.memory_space<vmem>>, vector<8x128xf32>
      tpu.vector_store %arg7[%c0_45, %c0_46], %86 {strides = array<i32>} : memref<8x128xf32, #tpu.memory_space<vmem>>, vector<8x128xf32>,
    } else {
    }
    return
  }
  func.func @transform_0(%arg0: i32, %arg1: i32) -> (i32, i32) {
    %c0_i32 = arith.constant 0 : i32
    %c0_i32_0 = arith.constant 0 : i32
    return %arg0, %c0_i32 : i32, i32
  }
  func.func @transform_1(%arg0: i32, %arg1: i32) -> (i32, i32) {
    %c0_i32 = arith.constant 0 : i32
    %c0_i32_0 = arith.constant 0 : i32
    %c0_i32_1 = arith.constant 0 : i32
    return %c0_i32, %c0_i32_0 : i32, i32
  }
  func.func @transform_2(%arg0: i32, %arg1: i32) -> (i32, i32) {
    %c0_i32 = arith.constant 0 : i32
    %c0_i32_0 = arith.constant 0 : i32
    %c0_i32_1 = arith.constant 0 : i32
    return %c0_i32, %c0_i32_0 : i32, i32
  }
  func.func @transform_3(%arg0: i32, %arg1: i32) -> (i32, i32) {
    %c0_i32 = arith.constant 0 : i32
    %c0_i32_0 = arith.constant 0 : i32
    return %c0_i32, %arg1 : i32, i32
  }
  func.func @transform_4(%arg0: i32, %arg1: i32) -> (i32, i32) {
    %c0_i32 = arith.constant 0 : i32
    %c0_i32_0 = arith.constant 0 : i32
    return %arg0, %c0_i32 : i32, i32
  }
  func.func @transform_5(%arg0: i32, %arg1: i32) -> (i32, i32) {
    %c0_i32 = arith.constant 0 : i32
    %c0_i32_0 = arith.constant 0 : i32
    %c0_i32_1 = arith.constant 0 : i32
    return %c0_i32, %c0_i32_0 : i32, i32
  }
}

</mosaic_0001>

<bundles_post_ra>
// kernel: tpu_custom_call.1
= control target key start
LH: loop header
LB: loop body
LE: loop exit
PB: predicated region body
PF: predicated region fallthrough
CT: control target
= control target key end

     0   :  { %10 = vsyncpa [#allocation7], 0  ;;  %s1809_s0 = inlined_call_operand.hbm [shape: bf16[64,32], index: 0, kind: input, shape index: {}]   ;;  %s1810_s1 = inlined_call_operand.hbm [shape: bf16[32,128], index: 1, kind: input, shape index: {}]   ;;  %s1811_s2 = inlined_call_operand.hbm [shape: f32[1,128], index: 2, kind: input, shape index: {}]   ;;  %s1812_s3 = inlined_call_operand.hbm [shape: bf16[128,256], index: 3, kind: input, shape index: {}]   ;;  %s1813_s4 = inlined_call_operand.hbm [shape: s32[64,1], index: 4, kind: input, shape index: {}]   ;;  %s1814_s5 = inlined_call_operand.hbm [shape: f32[8,128], index: 5, kind: output, shape index: {}]  }
   0x1   :  { %11 = vsyncpa [#allocation10], 0 }
   0x2   :  { %12 = vsyncpa [#allocation13], 0 }
   0x3   :  { %13 = vsyncpa [#allocation8], 0  ;;  %s1294_s18 = smov [#allocation9]   ;;  %s1295_s20 = smov [#allocation12]  }
   0x4   :  { %s31_s19 = sshll.u32 %s1294_s18, 4  ;;  %s53_s21 = sshll.u32 %s1295_s20, 4  ;;  %s32_s19 = int_to_ptr.vmem [resolvable:$true] %s31_s19  ;;  %s1337_s21 = int_to_ptr.vmem [resolvable:$true] %s53_s21 }
   0x5   :  { %s1154_s24 = scalar_lea.hbm %s1810_s1, 256 }
   0x6   :  { %p1155_p0 = scmp.ne.s32.totalorder %s1810_s1, %s1154_s24  ;;  %p1158_p1 = scmp.lt.u32.totalorder %s1154_s24, %s1810_s1 }
   0x8   :  { %p1160_p2 = pnand %p1158_p1, %p1155_p0 }
   0xa   :  { %1163 = shalt.err (!%p1160_p2)
}
   0xb   :  { %s1164_s29 = scalar_lea.vmem %s32_s19, 256  ;;  %p1169_p4 = scmp.lt.s32.totalorder %s32_s19, %s32_s19 }
   0xc   :  { %p1165_p3 = scmp.ne.s32.totalorder %s32_s19, %s1164_s29  ;;  %p1170_p5 = scmp.lt.s32.totalorder %s1164_s29, %s1164_s29 }
   0xe   :  { %p1171_p6 = por %p1170_p5, %p1169_p4 }
  0x10   :  { %p1172_p7 = pnand %p1171_p6, %p1165_p3 }
  0x12   :  { %1175 = shalt.err (!%p1172_p7)
}
  0x13   :  { %s1296_s30 = smov 64   ;;  %s1297_s6 = smov 4  }
  0x14   :  { %37 = dma.hbm_to_vmem [thread:$0]  %s1810_s1, 256, %s32_s19, [#allocation10], %s1296_s30, %s1296_s30, %s1297_s6  }
  0x15   :  { %s1176_s11 = scalar_lea.hbm %s1812_s3, 2048 }
  0x16   :  { %p1177_p8 = scmp.ne.s32.totalorder %s1812_s3, %s1176_s11  ;;  %p1180_p9 = scmp.lt.u32.totalorder %s1176_s11, %s1812_s3 }
  0x18   :  { %p1182_p10 = pnand %p1180_p9, %p1177_p8 }
  0x1a   :  { %1185 = shalt.err (!%p1182_p10)
}
  0x1b   :  { %s1186_s16 = scalar_lea.vmem %s1337_s21, 2048  ;;  %p1191_p12 = scmp.lt.s32.totalorder %s1337_s21, %s1337_s21 }
  0x1c   :  { %p1187_p11 = scmp.ne.s32.totalorder %s1337_s21, %s1186_s16  ;;  %p1192_p13 = scmp.lt.s32.totalorder %s1186_s16, %s1186_s16 }
  0x1e   :  { %p1193_p0 = por %p1192_p13, %p1191_p12 }
  0x20   :  { %p1194_p1 = pnand %p1193_p0, %p1187_p11 }
  0x22   :  { %1197 = shalt.err (!%p1194_p1)
}
  0x23   :  { %s1298_s1 = smov 128   ;;  %s1299_s17 = smov 8  }
  0x24   :  { %59 = dma.hbm_to_vmem [thread:$0]  %s1812_s3, 2048, %s1337_s21, [#allocation13], %s1298_s1, %s1298_s1, %s1299_s17  }
  0x25   :  { %s1300_s20 = smov [#allocation6]   ;;  %s1301_s23 = smov [#allocation11]  }
  0x26   :  { %s19_s22 = sshll.u32 %s1300_s20, 4  ;;  %s44_s24 = sshll.u32 %s1301_s23, 4  ;;  %s20_s22 = int_to_ptr.vmem [resolvable:$true] %s19_s22  ;;  %s45_s24 = int_to_ptr.vmem [resolvable:$true] %s44_s24 }
  0x27   :  { %s1198_s27 = scalar_lea.hbm %s1809_s0, 512 }
  0x28   :  { %p1199_p2 = scmp.ne.s32.totalorder %s1809_s0, %s1198_s27  ;;  %p1202_p3 = scmp.lt.u32.totalorder %s1198_s27, %s1809_s0 }
  0x2a   :  { %p1204_p4 = pnand %p1202_p3, %p1199_p2 }
  0x2c   :  { %1207 = shalt.err (!%p1204_p4)
}
  0x2d   :  { %s1208_s3 = scalar_lea.vmem %s20_s22, 512  ;;  %p1213_p6 = scmp.lt.s32.totalorder %s20_s22, %s20_s22 }
  0x2e   :  { %p1209_p5 = scmp.ne.s32.totalorder %s20_s22, %s1208_s3  ;;  %p1214_p7 = scmp.lt.s32.totalorder %s1208_s3, %s1208_s3 }
  0x30   :  { %p1215_p8 = por %p1214_p7, %p1213_p6 }
  0x32   :  { %p1216_p9 = pnand %p1215_p8, %p1209_p5 }
  0x34   :  { %1219 = shalt.err (!%p1216_p9)
}
  0x35   :  { %25 = dma.hbm_to_vmem [thread:$0]  %s1809_s0, 512, %s20_s22, [#allocation7], %s1296_s30, %s1296_s30, %s1297_s6  }
  0x36   :  { %s1220_s12 = scalar_lea.hbm %s1811_s2, 16 }
  0x37   :  { %p1221_p10 = scmp.ne.s32.totalorder %s1811_s2, %s1220_s12  ;;  %p1224_p11 = scmp.lt.u32.totalorder %s1220_s12, %s1811_s2 }
  0x39   :  { %p1226_p12 = pnand %p1224_p11, %p1221_p10 }
  0x3b   :  { %1229 = shalt.err (!%p1226_p12)
}
  0x3c   :  { %s1230_s18 = scalar_lea.vmem %s45_s24, 16  ;;  %s1234_s19 = scalar_lea.vmem %s45_s24, 32 }
  0x3d   :  { %p1231_p13 = scmp.ne.s32.totalorder %s45_s24, %s1230_s18  ;;  %p1235_p0 = scmp.lt.s32.totalorder %s45_s24, %s45_s24 }
  0x3e   :  { %p1236_p1 = scmp.lt.s32.totalorder %s1234_s19, %s1230_s18 }
  0x40   :  { %p1237_p2 = por %p1236_p1, %p1235_p0 }
  0x42   :  { %p1238_p3 = pnand %p1237_p2, %p1231_p13 }
  0x44   :  { %1241 = shalt.err (!%p1238_p3)
}
  0x45   :  { %47 = dma.hbm_to_vmem [thread:$0]  %s1811_s2, 16, %s45_s24, [#allocation10]  }
  0x46   :  { %s1302_s6 = smov [#allocation14]   ;;  %s1242_s25 = scalar_lea.hbm %s1813_s4, 1024 }
  0x47   :  { %s65_s20 = sshll.u32 %s1302_s6, 4  ;;  %p1243_p4 = scmp.ne.s32.totalorder %s1813_s4, %s1242_s25  ;;  %s66_s20 = int_to_ptr.vmem [resolvable:$true] %s65_s20 }
  0x48   :  { %p1246_p5 = scmp.lt.u32.totalorder %s1242_s25, %s1813_s4 }
  0x4a   :  { %p1248_p6 = pnand %p1246_p5, %p1243_p4 }
  0x4c   :  { %1251 = shalt.err (!%p1248_p6)
}
  0x4d   :  { %s1252_s7 = scalar_lea.vmem %s66_s20, 1024  ;;  %p1257_p8 = scmp.lt.s32.totalorder %s66_s20, %s66_s20 }
  0x4e   :  { %p1253_p7 = scmp.ne.s32.totalorder %s66_s20, %s1252_s7  ;;  %p1258_p9 = scmp.lt.s32.totalorder %s1252_s7, %s1252_s7 }
  0x50   :  { %p1259_p10 = por %p1258_p9, %p1257_p8 }
  0x52   :  { %p1260_p11 = pnand %p1259_p10, %p1253_p7 }
  0x54   :  { %1263 = shalt.err (!%p1260_p11)
}
  0x55   :  { %71 = dma.hbm_to_vmem [thread:$0]  %s1813_s4, 1024, %s66_s20, [#allocation13], %s1298_s1, %s1298_s1, %s1299_s17  }
  0x56   :  { %1286 = dma.done.wait [#allocation7], 512  }
  0x57   :  { %1287 = vsyncadd [#allocation7], 4294966784 }
  0x58   :  { %1288 = dma.done.wait [#allocation10], 272  }
  0x59   :  { %1289 = vsyncadd [#allocation10], 4294967024 }
  0x5a   :  { %1290 = dma.done.wait [#allocation13], 3072  }
  0x5b   :  { %1291 = vsyncadd [#allocation13], 4294964224  ;;  %v1044_v0 = vld [vmem:[#allocation9] sm:$0xff]   ;;  %v1045_v1 = vld [vmem:[#allocation9 + $0x8] sm:$0xff]   ;;  %vm149_vm0 = vcmask 261120   ;;  %v1303_v22 = vmov 0  }
  0x5c   :  { %997 = vmatprep.subr.bf16.mxu0 %v1044_v0  ;;  %v1046_v2 = vld [vmem:[#allocation6] sm:$0xff]   ;;  %v1047_v3 = vld [vmem:[#allocation6 + $0x8] sm:$0xff]   ;;  %v1048_v4 = vld [vmem:[#allocation6 + $0x10] sm:$0xff]   ;;  %410 = vmatprep.mubr.bf16.mxu1 %v1303_v22  ;;  %vm243_vm1 = vcmask 7168   ;;  %v1304_v52 = vmov -inf   ;;  %s1306_s17 = smov [#allocation15]  }
  0x5d   :  { %998 = vmatpush3.bf16.msra.mxu0 %v1044_v0  ;;  %1001 = vmatprep.mubr.msk.bf16.mxu0 %vm149_vm0, %v1046_v2  ;;  %v1050_v5 = vld [vmem:[#allocation12 + $0x4] ss:$8 sps:$4 sm:$0xff]   ;;  %v1052_v6 = vld [vmem:[#allocation12] ss:$8 sps:$4 sm:$0xff]   ;;  %v1053_v7 = vld [vmem:[#allocation12 + $0x14] ss:$8 sps:$4 sm:$0xff]  }
  0x5e   :  { %999 = vmatprep.subr.bf16.mxu0 %v1045_v1  ;;  %1009 = vmatprep.subr.bf16.mxu1 %v1050_v5  ;;  %v1055_v8 = vld [vmem:[#allocation12 + $0x10] ss:$8 sps:$4 sm:$0xff]   ;;  %v1056_v9 = vld [vmem:[#allocation12 + $0x24] ss:$8 sps:$4 sm:$0xff]   ;;  %v1058_v10 = vld [vmem:[#allocation12 + $0x20] ss:$8 sps:$4 sm:$0xff]  }
  0x5f   :  { %1017 = vmatpush1.bf16.msra.mxu1 %v1052_v6  ;;  %v1049_v11 = vld [vmem:[#allocation6 + $0x18] sm:$0xff]   ;;  %v1059_v12 = vld [vmem:[#allocation12 + $0x34] ss:$8 sps:$4 sm:$0xff]   ;;  %v1061_v13 = vld [vmem:[#allocation12 + $0x30] ss:$8 sps:$4 sm:$0xff]   ;;  %1043 = vset.pattern.permute.xlu1 %v1303_v22  ;;  %246 = vst.msk [vmem:[#allocation3 + $0x10] sm:$0xff] %vm243_vm1, %v1304_v52 }
  0x60   :  { %1010 = vmatprep.subr.bf16.mxu1 %v1053_v7  ;;  %v1062_v14 = vld [vmem:[#allocation12 + $0x44] ss:$8 sps:$4 sm:$0xff]   ;;  %v1064_v15 = vld [vmem:[#allocation12 + $0x40] ss:$8 sps:$4 sm:$0xff]   ;;  %v1065_v16 = vld [vmem:[#allocation12 + $0x54] ss:$8 sps:$4 sm:$0xff]   ;;  %1042 = vset.pattern.permute.xlu0 %v1303_v22 }
  0x61   :  { %1000 = vmatpush3.bf16.msra.mxu0 %v1045_v1  ;;  %v1067_v17 = vld [vmem:[#allocation12 + $0x50] ss:$8 sps:$4 sm:$0xff]   ;;  %v1068_v18 = vld [vmem:[#allocation12 + $0x64] ss:$8 sps:$4 sm:$0xff]   ;;  %v1070_v19 = vld [vmem:[#allocation12 + $0x60] ss:$8 sps:$4 sm:$0xff]  }
  0x62   :  { %368 = vmatprep.subr.bf16.mxu0 %v1050_v5  ;;  %v1071_v20 = vld [vmem:[#allocation12 + $0x74] ss:$8 sps:$4 sm:$0xff]   ;;  %v1073_v21 = vld [vmem:[#allocation12 + $0x70] ss:$8 sps:$4 sm:$0xff]   ;;  %244 = vst.msk [vmem:[#allocation3] sm:$0xff] %vm243_vm1, %v1304_v52  ;;  %245 = vst.msk [vmem:[#allocation3 + $0x8] sm:$0xff] %vm243_vm1, %v1304_v52 }
  0x63   :  { %1018 = vmatpush1.bf16.msra.mxu1 %v1055_v8  ;;  %v956_v23 = vld [vmem:[#allocation11] ss:$0 sm:$0xff]  ;;  %247 = vst.msk [vmem:[#allocation3 + $0x18] sm:$0xff] %vm243_vm1, %v1304_v52  ;;  %248 = vst.msk [vmem:[#allocation3 + $0x20] sm:$0xff] %vm243_vm1, %v1304_v52  ;;  %s945_s8 = sshll.u32 %s1306_s17, 4  ;;  %s946_s8 = int_to_ptr.vmem [resolvable:$true] %s945_s8 }
  0x64   :  { %1002 = vmatmul.mubr.msk.bf16.vlgmr.msra.gmra.mrb[0].mxu0 %vm149_vm0, %v1047_v3  ;;  %1011 = vmatprep.subr.bf16.mxu1 %v1056_v9  ;;  %249 = vst.msk [vmem:[#allocation3 + $0x28] sm:$0xff] %vm243_vm1, %v1304_v52  ;;  %250 = vst.msk [vmem:[#allocation3 + $0x30] sm:$0xff] %vm243_vm1, %v1304_v52  ;;  %s1264_s3 = scalar_lea.vmem %s946_s8, 128  ;;  %p1269_p13 = scmp.lt.s32.totalorder %s946_s8, %s946_s8 }
  0x65   :  { %1005 = vmatprep.mubr.msk.bf16.mxu0 %vm149_vm0, %v1048_v4  ;;  %369 = vmatpush1.bf16.msra.mxu0 %v1052_v6  ;;  %251 = vst.msk [vmem:[#allocation3 + $0x38] sm:$0xff] %vm243_vm1, %v1304_v52  ;;  %v1606_v52 = vld [vmem:[#allocation14 + $0x20] sm:$0xff]  ;;  %p1265_p12 = scmp.ne.s32.totalorder %s946_s8, %s1264_s3  ;;  %p1270_p0 = scmp.lt.s32.totalorder %s1264_s3, %s1264_s3 }
  0x66   :  { %370 = vmatprep.subr.bf16.mxu0 %v1053_v7 }
  0x67   :  { %1019 = vmatpush1.bf16.msra.mxu1 %v1058_v10  ;;  %p1271_p1 = por %p1270_p0, %p1269_p13 }
  0x68   :  { %1012 = vmatprep.subr.bf16.mxu1 %v1059_v12 }
  0x69   :  { %371 = vmatpush1.bf16.msra.mxu0 %v1055_v8  ;;  %p1272_p2 = pnand %p1271_p1, %p1265_p12 }
  0x6a   :  { %372 = vmatprep.subr.bf16.mxu0 %v1056_v9 }
  0x6b   :  { %1020 = vmatpush1.bf16.msra.mxu1 %v1061_v13 }
  0x6c   :  { %1006 = vmatmul.mubr.msk.bf16.gmra.mrb[4].mxu0 %vm149_vm0, %v1049_v11  ;;  %1013 = vmatprep.subr.bf16.mxu1 %v1062_v14 }
  0x6d   :  { %373 = vmatpush1.bf16.msra.mxu0 %v1058_v10  ;;  %400 = vmatprep.mubr.bf16.mxu0 %v1303_v22 }
  0x6e   :  { %374 = vmatprep.subr.bf16.mxu0 %v1059_v12 }
  0x6f   :  { %1021 = vmatpush1.bf16.msra.mxu1 %v1064_v15 }
  0x70   :  { %1014 = vmatprep.subr.bf16.mxu1 %v1065_v16 }
  0x71   :  { %375 = vmatpush1.bf16.msra.mxu0 %v1061_v13  ;;  %v1305_v13 = vmov 0.0  }
  0x72   :  { %376 = vmatprep.subr.bf16.mxu0 %v1062_v14  ;;  %252 = vst.msk [vmem:[#allocation4] sm:$0xff] %vm243_vm1, %v1305_v13  ;;  %253 = vst.msk [vmem:[#allocation4 + $0x8] sm:$0xff] %vm243_vm1, %v1305_v13  ;;  %v1508_v14 = vld [vmem:[#allocation3 + $0x10] sm:$0xff] }
  0x73   :  { %1022 = vmatpush1.bf16.msra.mxu1 %v1067_v17  ;;  %254 = vst.msk [vmem:[#allocation4 + $0x10] sm:$0xff] %vm243_vm1, %v1305_v13  ;;  %255 = vst.msk [vmem:[#allocation4 + $0x18] sm:$0xff] %vm243_vm1, %v1305_v13 }
  0x74   :  { %1015 = vmatprep.subr.bf16.mxu1 %v1068_v18  ;;  %256 = vst.msk [vmem:[#allocation4 + $0x20] sm:$0xff] %vm243_vm1, %v1305_v13  ;;  %257 = vst.msk [vmem:[#allocation4 + $0x28] sm:$0xff] %vm243_vm1, %v1305_v13 }
  0x75   :  { %377 = vmatpush1.bf16.msra.mxu0 %v1064_v15  ;;  %258 = vst.msk [vmem:[#allocation4 + $0x30] sm:$0xff] %vm243_vm1, %v1305_v13  ;;  %259 = vst.msk [vmem:[#allocation4 + $0x38] sm:$0xff] %vm243_vm1, %v1305_v13  ;;  %v1510_v15 = vld [vmem:[#allocation3] sm:$0xff] }
  0x76   :  { %378 = vmatprep.subr.bf16.mxu0 %v1065_v16  ;;  %260 = vst.msk [vmem:[#allocation5] sm:$0xff] %vm243_vm1, %v1305_v13  ;;  %261 = vst.msk [vmem:[#allocation5 + $0x8] sm:$0xff] %vm243_vm1, %v1305_v13 }
  0x77   :  { %1023 = vmatpush1.bf16.msra.mxu1 %v1070_v19  ;;  %262 = vst.msk [vmem:[#allocation5 + $0x10] sm:$0xff] %vm243_vm1, %v1305_v13  ;;  %263 = vst.msk [vmem:[#allocation5 + $0x18] sm:$0xff] %vm243_vm1, %v1305_v13 }
  0x78   :  { %1016 = vmatprep.subr.bf16.mxu1 %v1071_v20  ;;  %264 = vst.msk [vmem:[#allocation5 + $0x20] sm:$0xff] %vm243_vm1, %v1305_v13  ;;  %265 = vst.msk [vmem:[#allocation5 + $0x28] sm:$0xff] %vm243_vm1, %v1305_v13 }
  0x79   :  { %379 = vmatpush1.bf16.msra.mxu0 %v1067_v17  ;;  %266 = vst.msk [vmem:[#allocation5 + $0x30] sm:$0xff] %vm243_vm1, %v1305_v13  ;;  %267 = vst.msk [vmem:[#allocation5 + $0x38] sm:$0xff] %vm243_vm1, %v1305_v13 }
  0x7a   :  { %380 = vmatprep.subr.bf16.mxu0 %v1068_v18 }
  0x7b   :  { %1024 = vmatpush1.bf16.msra.mxu1 %v1073_v21 }
  0x7d   :  { %381 = vmatpush1.bf16.msra.mxu0 %v1070_v19 }
  0x7e   :  { %382 = vmatprep.subr.bf16.mxu0 %v1071_v20  ;;  %v1518_v20 = vld [vmem:[#allocation3 + $0x18] sm:$0xff] }
  0x81   :  { %383 = vmatpush1.bf16.msra.mxu0 %v1073_v21 }
 0x137   :  { %v1003_v24 = vpop.f32.mrb[0].mxu0 }
 0x138   :  { %v205_v25 = vadd.f32 %v1003_v24, %v956_v23  ;;  %v196_v26 = vpop.f32.mrb[1].mxu0 }
 0x139   :  { %v197_v27 = vadd.f32 %v956_v23, %v196_v26  ;;  %v1004_v28 = vpop.f32.mrb[2].mxu0 }
 0x13a   :  { %1074 = vtanh.f32 %v205_v25  ;;  %v208_v29 = vadd.f32 %v1004_v28, %v956_v23  ;;  %v199_v30 = vpop.f32.mrb[3].mxu0 }
 0x13b   :  { %1076 = vtanh.f32 %v197_v27  ;;  %v200_v31 = vadd.f32 %v956_v23, %v199_v30  ;;  %v1535_v27 = vld [vmem:[#allocation14 + $0x8] sm:$0xff] }
 0x13c   :  { %1078 = vtanh.f32 %v208_v29  ;;  %v1545_v30 = vld [vmem:[#allocation3 + $0x20] sm:$0xff] }
 0x13d   :  { %1080 = vtanh.f32 %v200_v31 }
 0x13f   :  { %v1007_v32 = vpop.f32.mrb[4].mxu0 }
 0x140   :  { %v221_v33 = vadd.f32 %v1007_v32, %v956_v23  ;;  %v212_v34 = vpop.f32.mrb[5].mxu0 }
 0x141   :  { %v213_v35 = vadd.f32 %v956_v23, %v212_v34  ;;  %v1008_v36 = vpop.f32.mrb[6].mxu0  ;;  %v1554_v34 = vld [vmem:[#allocation14 + $0x18] sm:$0xff] }
 0x142   :  { %1082 = vtanh.f32 %v221_v33  ;;  %v224_v37 = vadd.f32 %v1008_v36, %v956_v23  ;;  %v215_v38 = vpop.f32.mrb[7].mxu0  ;;  %v1552_v33 = vld [vmem:[#allocation3 + $0x28] sm:$0xff] }
 0x143   :  { %1084 = vtanh.f32 %v213_v35  ;;  %v216_v39 = vadd.f32 %v956_v23, %v215_v38 }
 0x144   :  { %v1075_v40 = vpop.eup %1074  ;;  %1086 = vtanh.f32 %v224_v37 }
 0x145   :  { %v1077_v41 = vpop.eup %1076  ;;  %1088 = vtanh.f32 %v216_v39  ;;  %v1568_v39 = vld [vmem:[#allocation14 + $0x28] sm:$0xff] }
 0x146   :  { %v1079_v42 = vpop.eup %1078 }
 0x147   :  { %v1081_v43 = vpop.eup %1080  ;;  %v236_v44 = vpack.c.bf16 %v1079_v42, %v1075_v40 }
 0x148   :  { %v235_v45 = vpack.c.bf16 %v1081_v43, %v1077_v41  ;;  %v1575_v41 = vld [vmem:[#allocation3 + $0x30] sm:$0xff]  ;;  %v1578_v43 = vld [vmem:[#allocation3 + $0x38] sm:$0xff] }
 0x149   :  { %411 = vmatmul.mubr.bf16.vlgmr.msra.gmra.mrb[0].mxu1 %v236_v44  ;;  %v1580_v44 = vld [vmem:[#allocation14 + $0x38] sm:$0xff] }
 0x14a   :  { %401 = vmatmul.mubr.bf16.vlgmr.msra.gmra.mrb[8].mxu0 %v235_v45  ;;  %420 = vmatprep.mubr.bf16.mxu1 %v1303_v22 }
 0x14c   :  { %v1083_v46 = vpop.eup %1082 }
 0x14d   :  { %v1085_v47 = vpop.eup %1084 }
 0x14e   :  { %v1087_v48 = vpop.eup %1086 }
 0x14f   :  { %v1089_v49 = vpop.eup %1088  ;;  %v238_v50 = vpack.c.bf16 %v1087_v48, %v1083_v46 }
 0x150   :  { %v237_v51 = vpack.c.bf16 %v1089_v49, %v1085_v47 }
 0x152   :  { %421 = vmatmul.mubr.bf16.gmra.mrb[4].mxu1 %v237_v51  ;;  %v1603_v51 = vld [vmem:[#allocation14 + $0x10] sm:$0xff] }
 0x153   :  { %430 = vmatprep.mubr.bf16.mxu1 %v1303_v22  ;;  %v1525_v22 = vld [vmem:[#allocation3 + $0x8] sm:$0xff] }
 0x15a   :  { %431 = vmatmul.mubr.bf16.gmra.mrb[8].mxu1 %v238_v50  ;;  %v1600_v50 = vld [vmem:[#allocation14] sm:$0xff] }
 0x21c   :  { %v1428_v53 = vpop.f32.mrb[0].mxu1 }
 0x21d   :  { %v1430_v54 = vpop.f32.mrb[8].mxu0  ;;  %v1432_v55 = vpop.f32.mrb[1].mxu1 }
 0x21e   :  { %v1434_v56 = vpop.f32.mrb[9].mxu0  ;;  %v1436_v57 = vpop.f32.mrb[2].mxu1  ;;  %v470_v58 = vmax.f32 %v1428_v53, %v1432_v55 }
 0x21f   :  { %v1440_v59 = vpop.f32.mrb[10].mxu0  ;;  %v1442_v60 = vpop.f32.mrb[3].mxu1  ;;  %v464_v61 = vmax.f32 %v1430_v54, %v1434_v56 }
 0x220   :  { %471 = vmax.xlane.f32.xlu1 %v470_v58  ;;  %v1446_v62 = vpop.f32.mrb[11].mxu0  ;;  %v473_v63 = vmax.f32 %v1436_v57, %v1442_v60  ;;  %v1609_v58 = vld [vmem:[#allocation14 + $0x30] sm:$0xff] }
 0x221   :  { %465 = vmax.xlane.f32.xlu0 %v464_v61  ;;  %v467_v0 = vmax.f32 %v1440_v59, %v1446_v62  ;;  %v1815_v61 = vlaneseq }
 0x224   :  { %474 = vmax.xlane.f32.xlu1 %v473_v63  ;;  %v1613_v63 = vand.u32 127, %v1815_v61 }
 0x225   :  { %v1452_v1 = vpop.f32.mrb[4].mxu1  ;;  %468 = vmax.xlane.f32.xlu0 %v467_v0 }
 0x226   :  { %v1454_v2 = vpop.f32.mrb[5].mxu1 }
 0x227   :  { %v1456_v3 = vpop.f32.mrb[6].mxu1  ;;  %v476_v4 = vmax.f32 %v1452_v1, %v1454_v2 }
 0x228   :  { %v1460_v5 = vpop.f32.mrb[7].mxu1 }
 0x229   :  { %477 = vmax.xlane.f32.xlu0 %v476_v4  ;;  %v479_v6 = vmax.f32 %v1456_v3, %v1460_v5 }
 0x22b   :  { %480 = vmax.xlane.f32.xlu1 %v479_v6 }
 0x22d   :  { %v1464_v7 = vpop.f32.mrb[8].mxu1 }
 0x22e   :  { %v1466_v8 = vpop.f32.mrb[9].mxu1 }
 0x22f   :  { %v1468_v9 = vpop.f32.mrb[10].mxu1  ;;  %v482_v10 = vmax.f32 %v1464_v7, %v1466_v8 }
 0x230   :  { %v1472_v11 = vpop.f32.mrb[11].mxu1 }
 0x231   :  { %483 = vmax.xlane.f32.xlu0 %v482_v10  ;;  %v485_v12 = vmax.f32 %v1468_v9, %v1472_v11 }
 0x233   :  { %486 = vmax.xlane.f32.xlu1 %v485_v12 }
 0x2ad   :  { %v472_v16 = vpop.xlane.xlu1 %471 }
 0x2ae   :  { %v1513_v17 = vmax.f32 %v1508_v14, %v472_v16  ;;  %v466_v18 = vpop.xlane.xlu0 %465 }
 0x2af   :  { %v1516_v19 = vmax.f32 %v1510_v15, %v466_v18  ;;  %v1620_v18 = vadd.s32 128, %v1613_v63 }
 0x2b0   :  { %667 = vst.msk [vmem:[#allocation3 + $0x10] sm:$0xff] %vm243_vm1, %v1513_v17  ;;  %548 = vperm.xlu1 %1043, %v1513_v17  }
 0x2b1   :  { %v504_v23 = vsub.f32 %v1510_v15, %v1516_v19  ;;  %665 = vst.msk [vmem:[#allocation3] sm:$0xff] %vm243_vm1, %v1516_v19  ;;  %v475_v24 = vpop.xlane.xlu1 %474  ;;  %538 = vperm.xlu0 %1042, %v1516_v19  }
 0x2b2   :  { %v1533_v25 = vmax.f32 %v1518_v20, %v475_v24  ;;  %v469_v26 = vpop.xlane.xlu0 %468 }
 0x2b3   :  { %v1538_v28 = vmax.f32 %v1525_v22, %v469_v26 }
 0x2b4   :  { %v507_v29 = vsub.f32 %v1518_v20, %v1533_v25  ;;  %668 = vst.msk [vmem:[#allocation3 + $0x18] sm:$0xff] %vm243_vm1, %v1533_v25  ;;  %553 = vperm.xlu1 %1043, %v1533_v25   ;;  %v496_v25 = vld [vmem:[#allocation4] sm:$0xff] }
 0x2b5   :  { %v505_v31 = vsub.f32 %v1525_v22, %v1538_v28  ;;  %666 = vst.msk [vmem:[#allocation3 + $0x8] sm:$0xff] %vm243_vm1, %v1538_v28  ;;  %685 = vperm.xlu0 %1042, %v1535_v27  }
 0x2b6   :  { %v478_v32 = vpop.xlane.xlu0 %477 }
 0x2b7   :  { %v1557_v35 = vmax.f32 %v1545_v30, %v478_v32 }
 0x2b8   :  { %v481_v36 = vpop.xlane.xlu1 %480  ;;  %543 = vperm.xlu1 %1043, %v1538_v28  }
 0x2b9   :  { %669 = vst.msk [vmem:[#allocation3 + $0x20] sm:$0xff] %vm243_vm1, %v1557_v35  ;;  %v1565_v38 = vmax.f32 %v1552_v33, %v481_v36  ;;  %691 = vperm.xlu0 %1042, %v1554_v34  }
 0x2bb   :  { %670 = vst.msk [vmem:[#allocation3 + $0x28] sm:$0xff] %vm243_vm1, %v1565_v38  ;;  %v1818_v20 = vsub.f32 %v1552_v33, %v1565_v38 }
 0x2bc   :  { %558 = vperm.xlu1 %1043, %v1557_v35  }
 0x2bd   :  { %697 = vperm.xlu0 %1042, %v1568_v39  }
 0x2be   :  { %v484_v42 = vpop.xlane.xlu0 %483 }
 0x2bf   :  { %v1583_v45 = vmax.f32 %v1575_v41, %v484_v42 }
 0x2c0   :  { %v487_v46 = vpop.xlane.xlu1 %486  ;;  %563 = vperm.xlu1 %1043, %v1565_v38  }
 0x2c1   :  { %671 = vst.msk [vmem:[#allocation3 + $0x30] sm:$0xff] %vm243_vm1, %v1583_v45  ;;  %v1591_v48 = vmax.f32 %v1578_v43, %v487_v46  ;;  %703 = vperm.xlu0 %1042, %v1580_v44  }
 0x2c3   :  { %672 = vst.msk [vmem:[#allocation3 + $0x38] sm:$0xff] %vm243_vm1, %v1591_v48  ;;  %v1820_v33 = vsub.f32 %v1578_v43, %v1591_v48 }
 0x2c4   :  { %568 = vperm.xlu1 %1043, %v1583_v45  }
 0x2c5   :  { %v526_v38 = vmul.f32 1.442695, %v1820_v33 }
 0x2c8   :  { %573 = vperm.xlu1 %1043, %v1591_v48  }
 0x2cc   :  { %682 = vperm.xlu1 %1043, %v1600_v50  }
 0x2d0   :  { %688 = vperm.xlu1 %1043, %v1603_v51  }
 0x2d4   :  { %694 = vperm.xlu1 %1043, %v1606_v52  }
 0x2d8   :  { %700 = vperm.xlu1 %1043, %v1609_v58  }
 0x32f   :  { %v549_v0 = vpop.permute.xlu1 %548 }
 0x330   :  { %v580_v4 = vsub.f32 %v1428_v53, %v549_v0  ;;  %v581_v6 = vsub.f32 %v1432_v55, %v549_v0  ;;  %v539_v10 = vpop.permute.xlu0 %538 }
 0x331   :  { %v576_v12 = vsub.f32 %v1430_v54, %v539_v10  ;;  %v577_v16 = vsub.f32 %v1434_v56, %v539_v10 }
 0x332   :  { %v600_v24 = vmul.f32 1.442695, %v580_v4  ;;  %v602_v26 = vmul.f32 1.442695, %v581_v6 }
 0x333   :  { %v592_v32 = vmul.f32 1.442695, %v576_v12  ;;  %v594_v36 = vmul.f32 1.442695, %v577_v16  ;;  %v554_v42 = vpop.permute.xlu1 %553 }
 0x334   :  { %1090 = vpow2.f32 %v600_v24  ;;  %v582_v46 = vsub.f32 %v1436_v57, %v554_v42  ;;  %v583_v61 = vsub.f32 %v1442_v60, %v554_v42  ;;  %v686_v49 = vpop.permute.xlu0 %685 }
 0x335   :  { %1092 = vpow2.f32 %v602_v26  ;;  %vm707_vm2 = vcmp.eq.s32.totalorder %v1613_v63, %v686_v49  ;;  %vm708_vm3 = vcmp.eq.s32.totalorder %v1620_v18, %v686_v49 }
 0x336   :  { %1094 = vpow2.f32 %v592_v32  ;;  %v604_v0 = vmul.f32 1.442695, %v582_v46  ;;  %v606_v10 = vmul.f32 1.442695, %v583_v61  ;;  %v723_v4 = vsel %vm707_vm2, %v1440_v59, 0.0 }
 0x337   :  { %1096 = vpow2.f32 %v594_v36  ;;  %v544_v6 = vpop.permute.xlu1 %543  ;;  %v724_v12 = vsel %vm708_vm3, %v1446_v62, 0.0  ;;  %vm837_vm3 = vcmp.ge.s32.totalorder %v1535_v27, 0 }
 0x338   :  { %1098 = vpow2.f32 %v604_v0  ;;  %v578_v16 = vsub.f32 %v1440_v59, %v544_v6  ;;  %v579_v24 = vsub.f32 %v1446_v62, %v544_v6  ;;  %v692_v42 = vpop.permute.xlu0 %691  ;;  %v1630_v26 = vadd.f32 %v724_v12, %v723_v4 }
 0x339   :  { %1100 = vpow2.f32 %v606_v10  ;;  %vm711_vm4 = vcmp.eq.s32.totalorder %v1613_v63, %v692_v42  ;;  %vm712_vm5 = vcmp.eq.s32.totalorder %v1620_v18, %v692_v42 }
 0x33a   :  { %v596_v49 = vmul.f32 1.442695, %v578_v16  ;;  %v598_v61 = vmul.f32 1.442695, %v579_v24  ;;  %v727_v32 = vsel %vm711_vm4, %v1436_v57, 0.0  ;;  %v728_v36 = vsel %vm712_vm5, %v1442_v60, 0.0 }
 0x33b   :  { %v559_v46 = vpop.permute.xlu1 %558  ;;  %v1636_v0 = vadd.f32 %v728_v36, %v727_v32  ;;  %vm836_vm4 = vcmp.ge.s32.totalorder %v1600_v50, 0  ;;  %vm838_vm5 = vcmp.ge.s32.totalorder %v1603_v51, 0 }
 0x33c   :  { %1102 = vpow2.f32 %v596_v49  ;;  %v584_v59 = vsub.f32 %v1452_v1, %v559_v46  ;;  %v585_v62 = vsub.f32 %v1454_v2, %v559_v46  ;;  %v698_v4 = vpop.permute.xlu0 %697  ;;  %v1691_v27 = vsel %vm838_vm5, 1.0, %v1305_v13 }
 0x33d   :  { %1104 = vpow2.f32 %v598_v61  ;;  %vm715_vm6 = vcmp.eq.s32.totalorder %v1613_v63, %v698_v4  ;;  %vm716_vm7 = vcmp.eq.s32.totalorder %v1620_v18, %v698_v4  ;;  %v903_v51 = vsel %vm243_vm1, %v1691_v27, 0.0 }
 0x33e   :  { %v1091_v10 = vpop.eup %1090  ;;  %v608_v6 = vmul.f32 1.442695, %v584_v59  ;;  %v610_v12 = vmul.f32 1.442695, %v585_v62  ;;  %v731_v57 = vsel %vm715_vm6, %v1456_v3, 0.0  ;;  %v732_v60 = vsel %vm716_vm7, %v1460_v5, 0.0 }
 0x33f   :  { %v1093_v16 = vpop.eup %1092  ;;  %v564_v24 = vpop.permute.xlu1 %563  ;;  %v1644_v42 = vadd.f32 %v732_v60, %v731_v57  ;;  %vm839_vm6 = vcmp.ge.s32.totalorder %v1554_v34, 0  ;;  %vm840_vm7 = vcmp.ge.s32.totalorder %v1606_v52, 0  ;;  %vm932_vm5 = vcmp.eq.s32.totalorder %v1613_v63, 1 }
 0x340   :  { %v1095_v49 = vpop.eup %1094  ;;  %1106 = vpow2.f32 %v608_v6  ;;  %v586_v32 = vsub.f32 %v1456_v3, %v564_v24  ;;  %v587_v61 = vsub.f32 %v1460_v5, %v564_v24  ;;  %v704_v36 = vpop.permute.xlu0 %703  ;;  %v630_v46 = vadd.f32 %v1093_v16, %v1091_v10 }
 0x341   :  { %v1097_v4 = vpop.eup %1096  ;;  %1108 = vpow2.f32 %v610_v12  ;;  %vm719_vm8 = vcmp.eq.s32.totalorder %v1613_v63, %v704_v36  ;;  %vm720_vm9 = vcmp.eq.s32.totalorder %v1620_v18, %v704_v36 }
 0x342   :  { %v1099_v59 = vpop.eup %1098  ;;  %v612_v62 = vmul.f32 1.442695, %v586_v32  ;;  %v614_v47 = vmul.f32 1.442695, %v587_v61  ;;  %v624_v40 = vadd.f32 %v1097_v4, %v1095_v49  ;;  %v735_v57 = vsel %vm719_vm8, %v1468_v9, 0.0 }
 0x343   :  { %v1101_v60 = vpop.eup %1100  ;;  %v569_v6 = vpop.permute.xlu1 %568  ;;  %v736_v3 = vsel %vm720_vm9, %v1472_v11, 0.0  ;;  %vm841_vm8 = vcmp.ge.s32.totalorder %v1568_v39, 0  ;;  %vm842_vm9 = vcmp.ge.s32.totalorder %v1609_v58, 0 }
 0x344   :  { %1110 = vpow2.f32 %v612_v62  ;;  %625 = vadd.xlane.f32.xlu1 %v624_v40  ;;  %v588_v5 = vsub.f32 %v1464_v7, %v569_v6  ;;  %v589_v10 = vsub.f32 %v1466_v8, %v569_v6  ;;  %v633_v12 = vadd.f32 %v1101_v60, %v1099_v59 }
 0x345   :  { %1112 = vpow2.f32 %v614_v47  ;;  %v1654_v16 = vadd.f32 %v736_v3, %v735_v57 }
 0x346   :  { %v1103_v24 = vpop.eup %1102  ;;  %v616_v32 = vmul.f32 1.442695, %v588_v5  ;;  %v618_v61 = vmul.f32 1.442695, %v589_v10 }
 0x347   :  { %v1105_v49 = vpop.eup %1104  ;;  %v574_v36 = vpop.permute.xlu1 %573 }
 0x348   :  { %1114 = vpow2.f32 %v616_v32  ;;  %634 = vadd.xlane.f32.xlu1 %v633_v12  ;;  %v590_v4 = vsub.f32 %v1468_v9, %v574_v36  ;;  %v591_v62 = vsub.f32 %v1472_v11, %v574_v36  ;;  %v627_v40 = vadd.f32 %v1105_v49, %v1103_v24 }
 0x349   :  { %1116 = vpow2.f32 %v618_v61 }
 0x34a   :  { %v1107_v37 = vpop.eup %1106  ;;  %v620_v21 = vmul.f32 1.442695, %v590_v4  ;;  %v622_v6 = vmul.f32 1.442695, %v591_v62  ;;  %628 = vadd.xlane.f32.xlu0 %v627_v40 }
 0x34b   :  { %v1109_v47 = vpop.eup %1108  ;;  %v683_v59 = vpop.permute.xlu1 %682 }
 0x34c   :  { %1118 = vpow2.f32 %v620_v21  ;;  %vm705_vm10 = vcmp.eq.s32.totalorder %v1613_v63, %v683_v59  ;;  %vm706_vm11 = vcmp.eq.s32.totalorder %v1620_v18, %v683_v59  ;;  %v636_v57 = vadd.f32 %v1109_v47, %v1107_v37 }
 0x34d   :  { %1120 = vpow2.f32 %v622_v6  ;;  %v721_v60 = vsel %vm705_vm10, %v1430_v54, 0.0  ;;  %v722_v9 = vsel %vm706_vm11, %v1434_v56, 0.0  ;;  %v1710_v59 = vsel %vm841_vm8, 1.0, %v1305_v13 }
 0x34e   :  { %v1111_v11 = vpop.eup %1110  ;;  %631 = vadd.xlane.f32.xlu0 %v630_v46  ;;  %v737_v3 = vadd.f32 %v722_v9, %v721_v60  ;;  %v909_v52 = vsel %vm243_vm1, %v1710_v59, 0.0  ;;  %vm843_vm10 = vcmp.ge.s32.totalorder %v1580_v44, 0  ;;  %v1717_v60 = vsel %vm842_vm9, 1.0, %v1305_v13 }
 0x34f   :  { %v1113_v5 = vpop.eup %1112  ;;  %v689_v10 = vpop.permute.xlu1 %688  ;;  %v1720_v39 = vsel %vm843_vm10, 1.0, %v1305_v13  ;;  %v512_v44 = vmul.f32 1.442695, %v504_v23  ;;  %v522_v23 = vmul.f32 1.442695, %v1818_v20 }
 0x350   :  { %vm709_vm12 = vcmp.eq.s32.totalorder %v1613_v63, %v689_v10  ;;  %vm710_vm13 = vcmp.eq.s32.totalorder %v1620_v18, %v689_v10  ;;  %v639_v21 = vadd.f32 %v1113_v5, %v1111_v11  ;;  %v911_v11 = vsel %vm243_vm1, %v1717_v60, 0.0 }
 0x351   :  { %v725_v12 = vsel %vm709_vm12, %v1428_v53, 0.0  ;;  %v726_v24 = vsel %vm710_vm13, %v1432_v55, 0.0  ;;  %1122 = vpow2.f32 %v512_v44  ;;  %v514_v10 = vmul.f32 1.442695, %v505_v31  ;;  %v499_v31 = vld [vmem:[#allocation4 + $0x18] sm:$0xff] }
 0x352   :  { %v1115_v37 = vpop.eup %1114  ;;  %637 = vadd.xlane.f32.xlu0 %v636_v57  ;;  %640 = vadd.xlane.f32.xlu1 %v639_v21  ;;  %v743_v54 = vadd.f32 %v726_v24, %v725_v12  ;;  %v1816_v21 = vsub.f32 %v1508_v14, %v1513_v17  ;;  %v1817_v24 = vsub.f32 %v1545_v30, %v1557_v35  ;;  %v497_v35 = vld [vmem:[#allocation4 + $0x8] sm:$0xff]  ;;  %vm862_vm13 = vcmp.gt.f32.partialorder %v1691_v27, 0.0 }
 0x353   :  { %v1117_v32 = vpop.eup %1116  ;;  %v695_v56 = vpop.permute.xlu1 %694  ;;  %v1819_v14 = vsub.f32 %v1575_v41, %v1583_v45  ;;  %v498_v41 = vld [vmem:[#allocation4 + $0x10] sm:$0xff] }
 0x354   :  { %vm713_vm14 = vcmp.eq.s32.totalorder %v1613_v63, %v695_v56  ;;  %vm714_vm15 = vcmp.eq.s32.totalorder %v1620_v18, %v695_v56  ;;  %v642_v46 = vadd.f32 %v1117_v32, %v1115_v37  ;;  %v516_v12 = vmul.f32 1.442695, %v1816_v21 }
 0x355   :  { %v729_v61 = vsel %vm713_vm14, %v1452_v1, 0.0  ;;  %v730_v49 = vsel %vm714_vm15, %v1454_v2, 0.0  ;;  %v1679_v1 = vsel %vm837_vm3, 1.0, %v1305_v13  ;;  %v1682_v2 = vsel %vm836_vm4, 1.0, %v1305_v13 }
 0x356   :  { %v1119_v36 = vpop.eup %1118  ;;  %643 = vadd.xlane.f32.xlu0 %v642_v46  ;;  %v749_v53 = vadd.f32 %v730_v49, %v729_v61  ;;  %v520_v15 = vmul.f32 1.442695, %v1817_v24  ;;  %v524_v17 = vmul.f32 1.442695, %v1819_v14  ;;  %v674_v24 = vld [vmem:[#allocation5 + $0x8] sm:$0xff]  ;;  %vm860_vm11 = vcmp.gt.f32.partialorder %v1682_v2, 0.0 }
 0x357   :  { %v1121_v4 = vpop.eup %1120  ;;  %v701_v55 = vpop.permute.xlu1 %700  ;;  %vm861_vm12 = vcmp.gt.f32.partialorder %v1679_v1, 0.0  ;;  %vm867_vm3 = vcmp.gt.f32.partialorder %v1720_v39, 0.0  ;;  %vm928_vm4 = vcmp.eq.s32.totalorder %v1613_v63, 0 }
 0x358   :  { %vm717_vm0 = vcmp.eq.s32.totalorder %v1613_v63, %v701_v55  ;;  %vm718_vm2 = vcmp.eq.s32.totalorder %v1620_v18, %v701_v55  ;;  %v645_v62 = vadd.f32 %v1121_v4, %v1119_v36  ;;  %v1698_v18 = vsel %vm839_vm6, 1.0, %v1305_v13 }
 0x359   :  { %v733_v40 = vsel %vm717_vm0, %v1464_v7, 0.0  ;;  %v734_v6 = vsel %vm718_vm2, %v1466_v8, 0.0  ;;  %v901_v7 = vsel %vm243_vm1, %v1679_v1, 0.0  ;;  %v900_v8 = vsel %vm243_vm1, %v1682_v2, 0.0  ;;  %v785_v1 = vld [vmem:[#allocation3 + $0x28] sm:$0xff] }
 0x35a   :  { %738 = vadd.xlane.f32.xlu0 %v737_v3  ;;  %646 = vadd.xlane.f32.xlu1 %v645_v62  ;;  %v755_v47 = vadd.f32 %v734_v6, %v733_v40  ;;  %v902_v50 = vadd.f32 %v901_v7, %v900_v8  ;;  %v913_v3 = vsel %vm243_vm1, %v1720_v39, 0.0  ;;  %v501_v62 = vld [vmem:[#allocation4 + $0x28] sm:$0xff]  ;;  %v500_v40 = vld [vmem:[#allocation4 + $0x20] sm:$0xff]  ;;  %vm863_vm14 = vcmp.gt.f32.partialorder %v1698_v18, 0.0 }
 0x35b   :  { %v1123_v19 = vpop.eup %1122  ;;  %vm865_vm0 = vcmp.gt.f32.partialorder %v1710_v59, 0.0  ;;  %vm866_vm2 = vcmp.gt.f32.partialorder %v1717_v60, 0.0 }
 0x35c   :  { %v528_v22 = vmul.f32 %v1123_v19, %v496_v25  ;;  %v675_v19 = vld [vmem:[#allocation5 + $0x10] sm:$0xff] }
 0x35e   :  { %744 = vadd.xlane.f32.xlu0 %v743_v54  ;;  %741 = vadd.xlane.f32.xlu1 %v1630_v26  ;;  %v904_v26 = vadd.f32 %v903_v51, %v902_v50  ;;  %v502_v51 = vld [vmem:[#allocation4 + $0x30] sm:$0xff] }
 0x362   :  { %750 = vadd.xlane.f32.xlu0 %v749_v53  ;;  %747 = vadd.xlane.f32.xlu1 %v1636_v0  ;;  %v905_v0 = vsel %vm243_vm1, %v1698_v18, 0.0 }
 0x363   :  { %v906_v34 = vadd.f32 %v905_v0, %v904_v26 }
 0x366   :  { %756 = vadd.xlane.f32.xlu0 %v755_v47  ;;  %753 = vadd.xlane.f32.xlu1 %v1644_v42  ;;  %v1704_v42 = vsel %vm840_vm7, 1.0, %v1305_v13  ;;  %v518_v13 = vmul.f32 1.442695, %v507_v29 }
 0x367   :  { %vm864_vm15 = vcmp.gt.f32.partialorder %v1704_v42, 0.0 }
 0x368   :  { %1124 = vpow2.f32 %v518_v13 }
 0x369   :  { %1126 = vpow2.f32 %v514_v10 }
 0x36a   :  { %759 = vadd.xlane.f32.xlu1 %v1654_v16  ;;  %v907_v16 = vsel %vm243_vm1, %v1704_v42, 0.0  ;;  %1128 = vpow2.f32 %v516_v12 }
 0x36b   :  { %v908_v57 = vadd.f32 %v907_v16, %v906_v34  ;;  %1130 = vpow2.f32 %v520_v15 }
 0x36c   :  { %1132 = vpow2.f32 %v522_v23 }
 0x36d   :  { %v910_v9 = vadd.f32 %v909_v52, %v908_v57  ;;  %1134 = vpow2.f32 %v524_v17 }
 0x36e   :  { %1136 = vpow2.f32 %v526_v38  ;;  %v780_v38 = vld [vmem:[#allocation3] sm:$0xff] }
 0x36f   :  { %v912_v58 = vadd.f32 %v911_v11, %v910_v9  ;;  %v503_v11 = vld [vmem:[#allocation4 + $0x38] sm:$0xff] }
 0x371   :  { %v914_v5 = vadd.f32 %v913_v3, %v912_v58  ;;  %v673_v58 = vld [vmem:[#allocation5] sm:$0xff] }
 0x372   :  { %v1125_v28 = vpop.eup %1124 }
 0x373   :  { %915 = vadd.xlane.f32.xlu1 %v914_v5  ;;  %v1127_v30 = vpop.eup %1126  ;;  %v531_v54 = vmul.f32 %v1125_v28, %v499_v31  ;;  %v676_v31 = vld [vmem:[#allocation5 + $0x18] sm:$0xff] }
 0x374   :  { %v529_v46 = vmul.f32 %v1127_v30, %v497_v35  ;;  %v1129_v61 = vpop.eup %1128 }
 0x375   :  { %v1131_v36 = vpop.eup %1130  ;;  %v530_v53 = vmul.f32 %v1129_v61, %v498_v41  ;;  %v678_v61 = vld [vmem:[#allocation5 + $0x28] sm:$0xff] }
 0x376   :  { %v1133_v4 = vpop.eup %1132  ;;  %v532_v47 = vmul.f32 %v1131_v36, %v500_v40 }
 0x377   :  { %v533_v6 = vmul.f32 %v1133_v4, %v501_v62  ;;  %v1135_v7 = vpop.eup %1134 }
 0x378   :  { %v534_v16 = vmul.f32 %v1135_v7, %v502_v51  ;;  %v1137_v52 = vpop.eup %1136 }
 0x379   :  { %v535_v44 = vmul.f32 %v1137_v52, %v503_v11  ;;  %v783_v52 = vld [vmem:[#allocation3 + $0x18] sm:$0xff] }
 0x3d1   :  { %v626_v29 = vpop.xlane.xlu1 %625 }
 0x3d2   :  { %v648_v37 = vadd.f32 %v626_v29, %v528_v22 }
 0x3d4   :  { %657 = vst.msk [vmem:[#allocation4] sm:$0xff] %vm243_vm1, %v648_v37  ;;  %v677_v37 = vld [vmem:[#allocation5 + $0x20] sm:$0xff] }
 0x3d5   :  { %v635_v32 = vpop.xlane.xlu1 %634 }
 0x3d6   :  { %v651_v56 = vadd.f32 %v635_v32, %v531_v54 }
 0x3d7   :  { %v629_v49 = vpop.xlane.xlu0 %628 }
 0x3d8   :  { %660 = vst.msk [vmem:[#allocation4 + $0x18] sm:$0xff] %vm243_vm1, %v651_v56  ;;  %v649_v45 = vadd.f32 %v629_v49, %v529_v46 }
 0x3da   :  { %658 = vst.msk [vmem:[#allocation4 + $0x8] sm:$0xff] %vm243_vm1, %v649_v45  ;;  %v679_v45 = vld [vmem:[#allocation5 + $0x30] sm:$0xff] }
 0x3db   :  { %v632_v55 = vpop.xlane.xlu0 %631  ;;  %v788_v48 = vld [vmem:[#allocation4] sm:$0xff] }
 0x3dc   :  { %v650_v43 = vadd.f32 %v632_v55, %v530_v53  ;;  %1138 = vlog2.f32 %v788_v48  ;;  %v782_v55 = vld [vmem:[#allocation3 + $0x10] sm:$0xff]  ;;  %v781_v48 = vld [vmem:[#allocation3 + $0x8] sm:$0xff] }
 0x3de   :  { %659 = vst.msk [vmem:[#allocation4 + $0x10] sm:$0xff] %vm243_vm1, %v650_v43 }
 0x3df   :  { %v641_v8 = vpop.xlane.xlu1 %640  ;;  %v638_v50 = vpop.xlane.xlu0 %637  ;;  %v791_v57 = vld [vmem:[#allocation4 + $0x18] sm:$0xff] }
 0x3e0   :  { %v653_v26 = vadd.f32 %v641_v8, %v533_v6  ;;  %v652_v0 = vadd.f32 %v638_v50, %v532_v47 }
 0x3e1   :  { %v789_v34 = vld [vmem:[#allocation4 + $0x8] sm:$0xff] }
 0x3e2   :  { %662 = vst.msk [vmem:[#allocation4 + $0x28] sm:$0xff] %vm243_vm1, %v653_v26  ;;  %661 = vst.msk [vmem:[#allocation4 + $0x20] sm:$0xff] %vm243_vm1, %v652_v0  ;;  %1140 = vlog2.f32 %v789_v34  ;;  %v680_v0 = vld [vmem:[#allocation5 + $0x38] sm:$0xff] }
 0x3e3   :  { %v644_v9 = vpop.xlane.xlu0 %643  ;;  %1142 = vlog2.f32 %v791_v57 }
 0x3e4   :  { %v654_v3 = vadd.f32 %v644_v9, %v534_v16  ;;  %v784_v9 = vld [vmem:[#allocation3 + $0x20] sm:$0xff] }
 0x3e5   :  { %v790_v5 = vld [vmem:[#allocation4 + $0x10] sm:$0xff] }
 0x3e6   :  { %663 = vst.msk [vmem:[#allocation4 + $0x30] sm:$0xff] %vm243_vm1, %v654_v3  ;;  %1144 = vlog2.f32 %v790_v5  ;;  %v1139_v15 = vpop.eup %1138 }
 0x3e7   :  { %v647_v13 = vpop.xlane.xlu1 %646  ;;  %v739_v10 = vpop.xlane.xlu0 %738  ;;  %v797_v17 = vmul.f32 0.6931472, %v1139_v15 }
 0x3e8   :  { %v655_v21 = vadd.f32 %v647_v13, %v535_v44  ;;  %v761_v12 = vadd.f32 %v739_v10, %v673_v58 }
 0x3e9   :  { %v792_v20 = vld [vmem:[#allocation4 + $0x20] sm:$0xff]  ;;  %v793_v23 = vld [vmem:[#allocation4 + $0x28] sm:$0xff]  ;;  %v812_v41 = vadd.f32 %v797_v17, %v780_v38 }
 0x3ea   :  { %664 = vst.msk [vmem:[#allocation4 + $0x38] sm:$0xff] %vm243_vm1, %v655_v21  ;;  %769 = vst.msk [vmem:[#allocation5] sm:$0xff] %vm243_vm1, %v761_v12  ;;  %1146 = vlog2.f32 %v792_v20 }
 0x3eb   :  { %v742_v25 = vpop.xlane.xlu1 %741  ;;  %v745_v22 = vpop.xlane.xlu0 %744  ;;  %1148 = vlog2.f32 %v793_v23 }
 0x3ec   :  { %v762_v28 = vadd.f32 %v742_v25, %v674_v24  ;;  %v763_v14 = vadd.f32 %v745_v22, %v675_v19  ;;  %v1141_v29 = vpop.eup %1140  ;;  %v786_v22 = vld [vmem:[#allocation3 + $0x30] sm:$0xff] }
 0x3ed   :  { %v794_v30 = vld [vmem:[#allocation4 + $0x30] sm:$0xff]  ;;  %v1143_v35 = vpop.eup %1142  ;;  %v799_v49 = vmul.f32 0.6931472, %v1141_v29 }
 0x3ee   :  { %770 = vst.msk [vmem:[#allocation5 + $0x8] sm:$0xff] %vm243_vm1, %v762_v28  ;;  %771 = vst.msk [vmem:[#allocation5 + $0x10] sm:$0xff] %vm243_vm1, %v763_v14  ;;  %1150 = vlog2.f32 %v794_v30  ;;  %v803_v6 = vmul.f32 0.6931472, %v1143_v35 }
 0x3ef   :  { %v748_v54 = vpop.xlane.xlu1 %747  ;;  %v751_v33 = vpop.xlane.xlu0 %750  ;;  %v813_v51 = vadd.f32 %v799_v49, %v781_v48 }
 0x3f0   :  { %v1145_v32 = vpop.eup %1144  ;;  %v764_v56 = vadd.f32 %v748_v54, %v676_v31  ;;  %v765_v46 = vadd.f32 %v751_v33, %v677_v37  ;;  %v815_v44 = vadd.f32 %v803_v6, %v783_v52 }
 0x3f1   :  { %v795_v36 = vld [vmem:[#allocation4 + $0x38] sm:$0xff]  ;;  %v801_v53 = vmul.f32 0.6931472, %v1145_v32  ;;  %v820_v4 = vld [vmem:[#allocation5] sm:$0xff] }
 0x3f2   :  { %772 = vst.msk [vmem:[#allocation5 + $0x18] sm:$0xff] %vm243_vm1, %v764_v56  ;;  %773 = vst.msk [vmem:[#allocation5 + $0x20] sm:$0xff] %vm243_vm1, %v765_v46  ;;  %1152 = vlog2.f32 %v795_v36  ;;  %v828_v62 = vsub.f32 %v812_v41, %v820_v4  ;;  %v787_v46 = vld [vmem:[#allocation3 + $0x38] sm:$0xff] }
 0x3f3   :  { %v754_v40 = vpop.xlane.xlu1 %753  ;;  %v757_v43 = vpop.xlane.xlu0 %756  ;;  %v814_v47 = vadd.f32 %v801_v53, %v782_v55 }
 0x3f4   :  { %v1147_v7 = vpop.eup %1146  ;;  %v766_v8 = vadd.f32 %v754_v40, %v678_v61  ;;  %v767_v50 = vadd.f32 %v757_v43, %v679_v45  ;;  %v868_v58 = vsel %vm860_vm11, %v828_v62, 0.0 }
 0x3f5   :  { %v1149_v26 = vpop.eup %1148  ;;  %v805_v34 = vmul.f32 0.6931472, %v1147_v7  ;;  %v821_v16 = vld [vmem:[#allocation5 + $0x8] sm:$0xff]  ;;  %v822_v57 = vld [vmem:[#allocation5 + $0x10] sm:$0xff]  ;;  %v876_v23 = vsel %vm243_vm1, %v868_v58, 0.0 }
 0x3f6   :  { %774 = vst.msk [vmem:[#allocation5 + $0x28] sm:$0xff] %vm243_vm1, %v766_v8  ;;  %775 = vst.msk [vmem:[#allocation5 + $0x30] sm:$0xff] %vm243_vm1, %v767_v50  ;;  %v829_v11 = vsub.f32 %v813_v51, %v821_v16  ;;  %v830_v3 = vsub.f32 %v814_v47, %v822_v57  ;;  %v807_v12 = vmul.f32 0.6931472, %v1149_v26 }
 0x3f7   :  { %v760_v5 = vpop.xlane.xlu1 %759  ;;  %v816_v13 = vadd.f32 %v805_v34, %v784_v9 }
 0x3f8   :  { %v1151_v10 = vpop.eup %1150  ;;  %v768_v21 = vadd.f32 %v760_v5, %v680_v0  ;;  %v869_v24 = vsel %vm861_vm12, %v829_v11, 0.0  ;;  %v870_v15 = vsel %vm862_vm13, %v830_v3, 0.0  ;;  %v817_v37 = vadd.f32 %v807_v12, %v785_v1 }
 0x3f9   :  { %v809_v19 = vmul.f32 0.6931472, %v1151_v10  ;;  %v823_v20 = vld [vmem:[#allocation5 + $0x18] sm:$0xff]  ;;  %v824_v2 = vld [vmem:[#allocation5 + $0x20] sm:$0xff]  ;;  %v877_v25 = vsel %vm243_vm1, %v869_v24, 0.0  ;;  %v879_v27 = vsel %vm243_vm1, %v870_v15, 0.0  ;;  %v1821_v3 = vlaneseq }
 0x3fa   :  { %776 = vst.msk [vmem:[#allocation5 + $0x38] sm:$0xff] %vm243_vm1, %v768_v21  ;;  %v831_v28 = vsub.f32 %v815_v44, %v823_v20  ;;  %v832_v14 = vsub.f32 %v816_v13, %v824_v2  ;;  %v878_v17 = vadd.f32 %v877_v25, %v876_v23 }
 0x3fb   :  { %v818_v29 = vadd.f32 %v809_v19, %v786_v22  ;;  %v925_v58 = vshrl.u32 %v1821_v3, 7 }
 0x3fc   :  { %v1153_v31 = vpop.eup %1152  ;;  %v871_v30 = vsel %vm863_vm14, %v831_v28, 0.0  ;;  %v872_v35 = vsel %vm864_vm15, %v832_v14, 0.0  ;;  %v880_v54 = vadd.f32 %v879_v27, %v878_v17 }
 0x3fd   :  { %v811_v33 = vmul.f32 0.6931472, %v1153_v31  ;;  %v825_v38 = vld [vmem:[#allocation5 + $0x28] sm:$0xff]  ;;  %v826_v32 = vld [vmem:[#allocation5 + $0x30] sm:$0xff]  ;;  %v881_v56 = vsel %vm243_vm1, %v871_v30, 0.0  ;;  %v883_v36 = vsel %vm243_vm1, %v872_v35, 0.0 }
 0x3fe   :  { %v833_v61 = vsub.f32 %v817_v37, %v825_v38  ;;  %v834_v49 = vsub.f32 %v818_v29, %v826_v32  ;;  %v882_v41 = vadd.f32 %v881_v56, %v880_v54 }
 0x3ff   :  { %v819_v45 = vadd.f32 %v811_v33, %v787_v46 }
 0x400   :  { %v873_v18 = vsel %vm865_vm0, %v833_v61, 0.0  ;;  %v874_v42 = vsel %vm866_vm2, %v834_v49, 0.0  ;;  %v884_v53 = vadd.f32 %v883_v36, %v882_v41  ;;  %v916_v7 = vpop.xlane.xlu1 %915 }
 0x401   :  { %v827_v4 = vld [vmem:[#allocation5 + $0x38] sm:$0xff]  ;;  %v885_v60 = vsel %vm243_vm1, %v873_v18, 0.0  ;;  %v887_v40 = vsel %vm243_vm1, %v874_v42, 0.0  ;;  %v917_v59 = vrot.slane %v916_v7, 4 }
 0x402   :  { %v835_v55 = vsub.f32 %v819_v45, %v827_v4  ;;  %v886_v62 = vadd.f32 %v885_v60, %v884_v53 }
 0x403   :  { %v918_v8 = vadd.f32 %v917_v59, %v916_v7 }
 0x404   :  { %v875_v43 = vsel %vm867_vm3, %v835_v55, 0.0  ;;  %v888_v48 = vadd.f32 %v887_v40, %v886_v62 }
 0x405   :  { %v889_v6 = vsel %vm243_vm1, %v875_v43, 0.0  ;;  %v919_v50 = vrot.slane %v918_v8, 2  ;;  %vm927_vm1 = vcmp.eq.s32.totalorder %v925_v58, 0 }
 0x406   :  { %v890_v47 = vadd.f32 %v889_v6, %v888_v48  ;;  %vm929_vm6 = vmand %vm927_vm1, %vm928_vm4 }
 0x407   :  { %v920_v39 = vadd.f32 %v919_v50, %v918_v8  ;;  %vm933_vm7 = vmand %vm927_vm1, %vm932_vm5 }
 0x408   :  { %891 = vadd.xlane.f32.xlu0 %v890_v47 }
 0x409   :  { %v921_v57 = vrot.slane %v920_v39, 1 }
 0x40b   :  { %v922_v11 = vadd.f32 %v921_v57, %v920_v39 }
 0x495   :  { %v892_v51 = vpop.xlane.xlu0 %891 }
 0x496   :  { %v893_v26 = vrot.slane %v892_v51, 4 }
 0x498   :  { %v894_v0 = vadd.f32 %v893_v26, %v892_v51 }
 0x49a   :  { %v895_v34 = vrot.slane %v894_v0, 2 }
 0x49c   :  { %v896_v16 = vadd.f32 %v895_v34, %v894_v0 }
 0x49e   :  { %v897_v52 = vrot.slane %v896_v16, 1 }
 0x4a0   :  { %v898_v9 = vadd.f32 %v897_v52, %v896_v16 }
 0x4a2   :  { %1025 = vpush %v898_v9 }
 0x4a3   :  { %1027 = vpush %v922_v11 }
 0x4d3   :  { %s1026_s4 = spop %1025 }
 0x4d4   :  { %v930_v5 = vstv %s1026_s4  ;;  %s1028_s1 = spop %1027 }
 0x4d5   :  { %v931_v44 = vsel %vm929_vm6, %v930_v5, 0.0  ;;  %v934_v13 = vstv %s1028_s1 }
 0x4d6   :  { %v935_v10 = vsel %vm933_vm7, %v934_v13, 0.0 }
 0x4d7   :  { %v936_v21 = vadd.f32 %v935_v10, %v931_v44 }
 0x4d9   :  { %938 = vst [vmem:[#allocation15] sm:$0xff] %v936_v21 }
 0x4da   :  { %1275 = shalt.err (!%p1272_p2)
}
 0x4db   :  { %s1276_s10 = scalar_lea.hbm %s1814_s5, 128 }
 0x4dc   :  { %p1277_p3 = scmp.ne.s32.totalorder %s1814_s5, %s1276_s10  ;;  %p1280_p4 = scmp.lt.u32.totalorder %s1276_s10, %s1814_s5 }
 0x4de   :  { %p1282_p5 = pnand %p1280_p4, %p1277_p3 }
 0x4e0   :  { %1285 = shalt.err (!%p1282_p5)
}
 0x4e1   :  { %948 = dma.vmem_to_hbm [thread:$0]  %s946_s8, 128, %s1814_s5, [#allocation8]  }
 0x4e2   :  { %1292 = dma.done.wait [#allocation8], 128  }
 0x4e3   :  { %1293 = vsyncadd [#allocation8], 4294967168 }
 0x4e4   :  { %952 = vsyncpa [#allocation7], 1 }
 0x4e5   :  { %953 = vsyncpa [#allocation10], 1 }
 0x4e6   :  { %954 = vsyncpa [#allocation13], 1 }
 0x4e7   :  { %955 = vsyncpa [#allocation8], 1 }

</bundles_post_ra>
